<compile_context>
chip_gen: v6e
topology: v6e:2x2x1
jax: 0.10.0
libtpu: 0.0.40
codegen_flags: <defaults>
</compile_context>

<pallas_src>
import math
import functools

import jax
import jax.numpy as jnp
from jax.experimental import pallas as pl
from jax.experimental.pallas import tpu as pltpu

_VMEM_LIMIT = 32 * 1024 * 1024   # safe scoped budget on v5e / v6e / v7x


def _round_up(x, m):
    return (x + m - 1) // m * m


# ---------------- Pallas matmul (+bias +activation) kernel ------------------
def _matmul_kernel(a_ref, b_ref, bias_ref, o_ref, *, activation):
    acc = jnp.dot(a_ref[...], b_ref[...], preferred_element_type=jnp.float32)
    acc = acc + bias_ref[...]
    if activation == "relu":
        acc = jnp.maximum(acc, 0.0)
    elif activation == "sigmoid":
        acc = jax.nn.sigmoid(acc)        # exp / recip go to the EUP slot
    o_ref[...] = acc.astype(o_ref.dtype)


def matmul_bias_act(a, b, bias, activation="none", out_dtype=jnp.float32):
    """(M, K) @ (K, N) + bias, bf16 operands, f32 MXU accumulation.

    K / N are padded to lane multiples (guaranteed-legal Mosaic layout; the
    weight/bias side is tiny).  M padding is limited to the next multiple of 8
    when the whole M fits in one tile; larger M is tiled at 512 rows.
    """
    M, K = a.shape
    K2, N = b.shape
    assert K == K2
    Kp = _round_up(K, 128)
    Np = _round_up(N, 128)

    a_bf = a.astype(jnp.bfloat16)
    b_bf = b.astype(jnp.bfloat16)
    if Kp != K:
        a_bf = jnp.pad(a_bf, ((0, 0), (0, Kp - K)))
        b_bf = jnp.pad(b_bf, ((0, Kp - K), (0, 0)))
    if Np != N:
        b_bf = jnp.pad(b_bf, ((0, 0), (0, Np - N)))
    bias_p = jnp.pad(bias.astype(jnp.float32).reshape(1, N),
                     ((0, 0), (0, Np - N)))

    if M <= 1024:
        TM = _round_up(M, 8)             # single block; avoids big-M padding
        Mp = TM
    else:
        TM = 512                         # large tiles: avoids per-step overhead
        Mp = _round_up(M, TM)
    if Mp != M:
        a_bf = jnp.pad(a_bf, ((0, Mp - M), (0, 0)))

    out = pl.pallas_call(
        functools.partial(_matmul_kernel, activation=activation),
        out_shape=jax.ShapeDtypeStruct((Mp, Np), out_dtype),
        grid=(Mp // TM,),
        in_specs=[
            pl.BlockSpec((TM, Kp), lambda i: (i, 0)),
            pl.BlockSpec((Kp, Np), lambda i: (0, 0)),
            pl.BlockSpec((1, Np), lambda i: (0, 0)),
        ],
        out_specs=pl.BlockSpec((TM, Np), lambda i: (i, 0)),
        compiler_params=pltpu.CompilerParams(
            dimension_semantics=("parallel",),
            vmem_limit_bytes=_VMEM_LIMIT),
    )(a_bf, b_bf, bias_p)
    return out[:M, :N]


# ---------------- conv2d = bf16 im2col (glue) + Pallas matmul ----------------
def conv2d_nhwc(x, w, bias, stride=1, padding=1, activation="none",
                out_dtype=jnp.float32):
    """x: (B, H, W, Cin) channels-last.  w: (Cout, Cin, kh, kw) PyTorch layout."""
    B, H, W, Cin = x.shape
    Cout, _, kh, kw = w.shape
    Ho = (H + 2 * padding - kh) // stride + 1
    Wo = (W + 2 * padding - kw) // stride + 1
    xp = jnp.pad(x, ((0, 0), (padding, padding), (padding, padding), (0, 0)))
    xp = xp.astype(jnp.bfloat16)          # cast once, before 9x im2col expansion
    patches = [xp[:, i:i + stride * Ho:stride, j:j + stride * Wo:stride, :]
               for i in range(kh) for j in range(kw)]
    K = kh * kw * Cin
    Kp = _round_up(K, 128)
    if Kp != K:                           # build im2col already lane-padded
        patches.append(jnp.zeros((B, Ho, Wo, Kp - K), jnp.bfloat16))
    a = jnp.concatenate(patches, axis=-1).reshape(B * Ho * Wo, Kp)
    wm = w.transpose(2, 3, 1, 0).reshape(K, Cout)     # (kh*kw*Cin, Cout)
    if Kp != K:
        wm = jnp.pad(wm, ((0, Kp - K), (0, 0)))
    # TODO(synk): fold the kh*kw shifted views into the matmul grid as a
    # K-reduction axis (zero-copy im2col) for large images.
    out = matmul_bias_act(a, wm, bias, activation, out_dtype=out_dtype)
    return out.reshape(B, Ho, Wo, Cout)


# ---------------- Pallas renderer (graph) kernel -----------------------------
def _render_kernel(img_ref, mask_ref, p_ref, out_ref, cache_ref=None):
    img = img_ref[0]                      # (C, T)  lane-dense spatial tile, f32
    m = mask_ref[0]                       # (N, T)
    p = jnp.tanh(p_ref[0])                # (N, C)  region-wise per-channel gain
    n_regions = m.shape[0]
    acc = jnp.zeros_like(img)
    for n in range(n_regions):            # N is small (8): pure VPU, no MXU/XLU
        t_n = p[n][:, None] * m[n][None, :]            # (C, T)
        if cache_ref is not None:
            cache_ref[0, n] = jnp.clip(img * (1.0 + t_n), 0.0, 1.0
                                       ).astype(cache_ref.dtype)
        acc = acc + t_n
    out_ref[0] = jnp.clip(img * (1.0 + acc), 0.0, 1.0)


def render(img, masks, region_params, *, with_cache=True, hw_tile=16384):
    """img (B,C,H,W), masks (B,N,H,W), region_params (B,N,C)."""
    B, C, H, W = img.shape
    _, N, _, _ = masks.shape
    HW = H * W
    T = min(hw_tile, _round_up(HW, 128))  # lane-dense HW tile
    HWp = _round_up(HW, T)

    img_f = img.reshape(B, C, HW).astype(jnp.float32)
    m_f = masks.reshape(B, N, HW).astype(jnp.float32)
    if HWp != HW:
        img_f = jnp.pad(img_f, ((0, 0), (0, 0), (0, HWp - HW)))
        m_f = jnp.pad(m_f, ((0, 0), (0, 0), (0, HWp - HW)))
    p_f = region_params.astype(jnp.float32)

    grid = (B, HWp // T)
    in_specs = [
        pl.BlockSpec((1, C, T), lambda b, t: (b, 0, t)),
        pl.BlockSpec((1, N, T), lambda b, t: (b, 0, t)),
        pl.BlockSpec((1, N, C), lambda b, t: (b, 0, 0)),
    ]
    cparams = pltpu.CompilerParams(
        dimension_semantics=("parallel", "parallel"),
        vmem_limit_bytes=_VMEM_LIMIT)

    if with_cache:
        out, cache = pl.pallas_call(
            _render_kernel,
            out_shape=(jax.ShapeDtypeStruct((B, C, HWp), jnp.float32),
                       jax.ShapeDtypeStruct((B, N, C, HWp), jnp.bfloat16)),
            grid=grid, in_specs=in_specs,
            out_specs=(pl.BlockSpec((1, C, T), lambda b, t: (b, 0, t)),
                       pl.BlockSpec((1, N, C, T), lambda b, t: (b, 0, 0, t))),
            compiler_params=cparams,
        )(img_f, m_f, p_f)
        cache = cache[:, :, :, :HW].reshape(B, N, C, H, W)
    else:
        out = pl.pallas_call(
            _render_kernel,
            out_shape=jax.ShapeDtypeStruct((B, C, HWp), jnp.float32),
            grid=grid, in_specs=in_specs,
            out_specs=pl.BlockSpec((1, C, T), lambda b, t: (b, 0, t)),
            compiler_params=cparams,
        )(img_f, m_f, p_f)
        cache = None

    out = out[:, :, :HW].reshape(B, C, H, W)
    return out, cache


# ---------------- deterministic parameter init -------------------------------
def init_params(key, feat=16, n_masks=8, k_params=3):
    ks = jax.random.split(key, 4)

    def he(k, shape, fan_in):
        return jax.random.normal(k, shape, jnp.float32) * (2.0 / fan_in) ** 0.5

    return {
        "bb1_w": he(ks[0], (feat, 3, 3, 3), 3 * 9),
        "bb1_b": jnp.zeros((feat,), jnp.float32),
        "bb2_w": he(ks[1], (feat, feat, 3, 3), feat * 9),
        "bb2_b": jnp.zeros((feat,), jnp.float32),
        "mask_w": he(ks[2], (n_masks, feat, 3, 3), feat * 9),
        "mask_b": jnp.zeros((n_masks,), jnp.float32),
        "fc_w": he(ks[3], (feat, n_masks * k_params), feat),
        "fc_b": jnp.zeros((n_masks * k_params,), jnp.float32),
    }


# ---------------- RSFNet forward ---------------------------------------------
def rsfnet_forward(img, params, *, max_down_size=32, n_masks=8, cache=True):
    B, C, h, w = img.shape
    hh = int(math.ceil(float(h) / max_down_size) * max_down_size)
    ww = int(math.ceil(float(w) / max_down_size) * max_down_size)
    pad_h, pad_w = hh - h, ww - w

    # F.pad(..., 'reflect')
    x = jnp.pad(img, ((0, 0), (0, 0),
                      (pad_h // 2, pad_h - pad_h // 2),
                      (pad_w // 2, pad_w - pad_w // 2)), mode="reflect")
    # NOTE: the `max(hh, ww) > 720` bilinear downscale branch is statically
    # skipped at these shapes (same control flow as the PyTorch code).

    # convert to channels-last ONCE; backbone/head stay NHWC throughout
    x = x.transpose(0, 2, 3, 1)

    # extract_feat (backbone) — Pallas MXU matmul-backed convs, bf16 activations
    f = conv2d_nhwc(x, params["bb1_w"], params["bb1_b"], stride=2, padding=1,
                    activation="relu", out_dtype=jnp.bfloat16)
    f = conv2d_nhwc(f, params["bb2_w"], params["bb2_b"], stride=2, padding=1,
                    activation="relu", out_dtype=jnp.bfloat16)

    # head -> outs = [masks, region params]
    masks = conv2d_nhwc(f, params["mask_w"], params["mask_b"], stride=1,
                        padding=1, activation="sigmoid",
                        out_dtype=jnp.float32)          # (B, hh/4, ww/4, N)
    pooled = jnp.mean(f.astype(jnp.float32), axis=(1, 2))        # (B, feat)
    p = matmul_bias_act(pooled, params["fc_w"], params["fc_b"], "none")
    p = p.reshape(B, n_masks, 3)                                  # (B, N, 3)

    # outs[0] = F.interpolate(outs[0], size=[hh, ww], 'bilinear'); crop the pad
    masks_up = jax.image.resize(masks, (B, hh, ww, n_masks), method="bilinear")
    masks_crop = masks_up[:, pad_h // 2:pad_h // 2 + h,
                          pad_w // 2:pad_w // 2 + w, :]
    masks_nchw = masks_crop.transpose(0, 3, 1, 2)       # NCHW module output
    # TODO(synk): the 4x bilinear mask upsample could be fused into the
    # renderer HW-tile loop to avoid materializing full-res masks in HBM.

    # graph(img, masks, params, cache) — Pallas renderer kernel (HW-tiled)
    result, cache_imgs = render(img, masks_nchw, p, with_cache=cache)

    out = {"result": result, "masks": masks_nchw, "params": p}
    if cache:
        out["cache"] = cache_imgs        # bf16 per-region renders
    return out


if __name__ == "__main__":
    key = jax.random.PRNGKey(0)
    k_img, k_par = jax.random.split(key)
    img = jax.random.uniform(k_img, (2, 3, 16, 16), dtype=jnp.float32)
    params = init_params(k_par, feat=16, n_masks=8, k_params=3)

    fwd = jax.jit(functools.partial(rsfnet_forward, max_down_size=32,
                                    n_masks=8, cache=True))
    out = fwd(img, params)
    jax.block_until_ready(out)

    assert out["result"].shape == (2, 3, 16, 16)
    assert out["masks"].shape == (2, 8, 16, 16)
    assert out["params"].shape == (2, 8, 3)
    assert out["cache"].shape == (2, 8, 3, 16, 16)
    print("KERNEL_OK")
</pallas_src>

<mosaic_0001>
module attributes {stable_mosaic.version = 11 : i64} {
  func.func @_matmul_kernel(%arg0: i32, %arg1: memref<512x128xbf16, #tpu.memory_space<vmem>>, %arg2: memref<128x128xbf16, #tpu.memory_space<vmem>>, %arg3: memref<1x128xf32, #tpu.memory_space<vmem>>, %arg4: memref<512x128xbf16, #tpu.memory_space<vmem>>) attributes {dimension_semantics = [#tpu.dimension_semantics<parallel>], iteration_bounds = array<i64: 1>, scalar_prefetch = 0 : i64, scratch_operands = 0 : i64, tpu.core_type = #tpu.core_type<tc>, window_params = [{transform_indices = @transform_0, window_bounds = array<i64: 512, 128>}, {pipeline_mode = #tpu.pipeline_mode<synchronous>, transform_indices = @transform_1, window_bounds = array<i64: 128, 128>}, {pipeline_mode = #tpu.pipeline_mode<synchronous>, transform_indices = @transform_2, window_bounds = array<i64: 1, 128>}, {transform_indices = @transform_3, window_bounds = array<i64: 512, 128>}]} {
    %c0 = arith.constant 0 : index
    %c0_0 = arith.constant 0 : index
    %0 = vector.load %arg1[%c0, %c0_0] : memref<512x128xbf16, #tpu.memory_space<vmem>>, vector<512x128xbf16>
    %c0_1 = arith.constant 0 : index
    %c0_2 = arith.constant 0 : index
    %1 = vector.load %arg2[%c0_1, %c0_2] : memref<128x128xbf16, #tpu.memory_space<vmem>>, vector<128x128xbf16>
    %cst = arith.constant dense<0.000000e+00> : vector<512x128xf32>
    %2 = tpu.matmul %0, %1, %cst {dimension_numbers = #tpu.dot_dimension_numbers<[1], [0], [0], [1], [0, 0, 1, 1], [], []>} : vector<512x128xbf16>, vector<128x128xbf16>, vector<512x128xf32> -> vector<512x128xf32>
    %c0_3 = arith.constant 0 : index
    %c0_4 = arith.constant 0 : index
    %3 = vector.load %arg3[%c0_3, %c0_4] : memref<1x128xf32, #tpu.memory_space<vmem>>, vector<1x128xf32>
    %4 = vector.broadcast %3 : vector<1x128xf32> to vector<512x128xf32>
    %5 = arith.addf %2, %4 : vector<512x128xf32>
    %cst_5 = arith.constant 0.000000e+00 : f32
    %6 = vector.broadcast %cst_5 : f32 to vector<512x128xf32>
    %7 = arith.maximumf %5, %6 : vector<512x128xf32>
    %8 = arith.truncf %7 : vector<512x128xf32> to vector<512x128xbf16>
    %c0_6 = arith.constant 0 : index
    %c0_7 = arith.constant 0 : index
    %9 = vector.load %arg4[%c0_6, %c0_7] : memref<512x128xbf16, #tpu.memory_space<vmem>>, vector<512x128xbf16>
    tpu.vector_store %arg4[%c0_6, %c0_7], %8 {strides = array<i32>} : memref<512x128xbf16, #tpu.memory_space<vmem>>, vector<512x128xbf16>,
    return
  }
  func.func @transform_0(%arg0: i32) -> (i32, i32) {
    %c0_i32 = arith.constant 0 : i32
    %c0_i32_0 = arith.constant 0 : i32
    return %arg0, %c0_i32 : i32, i32
  }
  func.func @transform_1(%arg0: i32) -> (i32, i32) {
    %c0_i32 = arith.constant 0 : i32
    %c0_i32_0 = arith.constant 0 : i32
    %c0_i32_1 = arith.constant 0 : i32
    return %c0_i32, %c0_i32_0 : i32, i32
  }
  func.func @transform_2(%arg0: i32) -> (i32, i32) {
    %c0_i32 = arith.constant 0 : i32
    %c0_i32_0 = arith.constant 0 : i32
    %c0_i32_1 = arith.constant 0 : i32
    return %c0_i32, %c0_i32_0 : i32, i32
  }
  func.func @transform_3(%arg0: i32) -> (i32, i32) {
    %c0_i32 = arith.constant 0 : i32
    %c0_i32_0 = arith.constant 0 : i32
    return %arg0, %c0_i32 : i32, i32
  }
}

module attributes {stable_mosaic.version = 11 : i64} {
  func.func @_matmul_kernel(%arg0: i32, %arg1: memref<128x256xbf16, #tpu.memory_space<vmem>>, %arg2: memref<256x128xbf16, #tpu.memory_space<vmem>>, %arg3: memref<1x128xf32, #tpu.memory_space<vmem>>, %arg4: memref<128x128xbf16, #tpu.memory_space<vmem>>) attributes {dimension_semantics = [#tpu.dimension_semantics<parallel>], iteration_bounds = array<i64: 1>, scalar_prefetch = 0 : i64, scratch_operands = 0 : i64, tpu.core_type = #tpu.core_type<tc>, window_params = [{transform_indices = @transform_0, window_bounds = array<i64: 128, 256>}, {pipeline_mode = #tpu.pipeline_mode<synchronous>, transform_indices = @transform_1, window_bounds = array<i64: 256, 128>}, {pipeline_mode = #tpu.pipeline_mode<synchronous>, transform_indices = @transform_2, window_bounds = array<i64: 1, 128>}, {transform_indices = @transform_3, window_bounds = array<i64: 128, 128>}]} {
    %c0 = arith.constant 0 : index
    %c0_0 = arith.constant 0 : index
    %0 = vector.load %arg1[%c0, %c0_0] : memref<128x256xbf16, #tpu.memory_space<vmem>>, vector<128x256xbf16>
    %c0_1 = arith.constant 0 : index
    %c0_2 = arith.constant 0 : index
    %1 = vector.load %arg2[%c0_1, %c0_2] : memref<256x128xbf16, #tpu.memory_space<vmem>>, vector<256x128xbf16>
    %cst = arith.constant dense<0.000000e+00> : vector<128x128xf32>
    %2 = tpu.matmul %0, %1, %cst {dimension_numbers = #tpu.dot_dimension_numbers<[1], [0], [0], [1], [0, 0, 1, 1], [], []>} : vector<128x256xbf16>, vector<256x128xbf16>, vector<128x128xf32> -> vector<128x128xf32>
    %c0_3 = arith.constant 0 : index
    %c0_4 = arith.constant 0 : index
    %3 = vector.load %arg3[%c0_3, %c0_4] : memref<1x128xf32, #tpu.memory_space<vmem>>, vector<1x128xf32>
    %4 = vector.broadcast %3 : vector<1x128xf32> to vector<128x128xf32>
    %5 = arith.addf %2, %4 : vector<128x128xf32>
    %cst_5 = arith.constant 0.000000e+00 : f32
    %6 = vector.broadcast %cst_5 : f32 to vector<128x128xf32>
    %7 = arith.maximumf %5, %6 : vector<128x128xf32>
    %8 = arith.truncf %7 : vector<128x128xf32> to vector<128x128xbf16>
    %c0_6 = arith.constant 0 : index
    %c0_7 = arith.constant 0 : index
    %9 = vector.load %arg4[%c0_6, %c0_7] : memref<128x128xbf16, #tpu.memory_space<vmem>>, vector<128x128xbf16>
    tpu.vector_store %arg4[%c0_6, %c0_7], %8 {strides = array<i32>} : memref<128x128xbf16, #tpu.memory_space<vmem>>, vector<128x128xbf16>,
    return
  }
  func.func @transform_0(%arg0: i32) -> (i32, i32) {
    %c0_i32 = arith.constant 0 : i32
    %c0_i32_0 = arith.constant 0 : i32
    return %arg0, %c0_i32 : i32, i32
  }
  func.func @transform_1(%arg0: i32) -> (i32, i32) {
    %c0_i32 = arith.constant 0 : i32
    %c0_i32_0 = arith.constant 0 : i32
    %c0_i32_1 = arith.constant 0 : i32
    return %c0_i32, %c0_i32_0 : i32, i32
  }
  func.func @transform_2(%arg0: i32) -> (i32, i32) {
    %c0_i32 = arith.constant 0 : i32
    %c0_i32_0 = arith.constant 0 : i32
    %c0_i32_1 = arith.constant 0 : i32
    return %c0_i32, %c0_i32_0 : i32, i32
  }
  func.func @transform_3(%arg0: i32) -> (i32, i32) {
    %c0_i32 = arith.constant 0 : i32
    %c0_i32_0 = arith.constant 0 : i32
    return %arg0, %c0_i32 : i32, i32
  }
}

module attributes {stable_mosaic.version = 11 : i64} {
  func.func @_matmul_kernel(%arg0: i32, %arg1: memref<128x256xbf16, #tpu.memory_space<vmem>>, %arg2: memref<256x128xbf16, #tpu.memory_space<vmem>>, %arg3: memref<1x128xf32, #tpu.memory_space<vmem>>, %arg4: memref<128x128xf32, #tpu.memory_space<vmem>>) attributes {dimension_semantics = [#tpu.dimension_semantics<parallel>], iteration_bounds = array<i64: 1>, scalar_prefetch = 0 : i64, scratch_operands = 0 : i64, tpu.core_type = #tpu.core_type<tc>, window_params = [{transform_indices = @transform_0, window_bounds = array<i64: 128, 256>}, {pipeline_mode = #tpu.pipeline_mode<synchronous>, transform_indices = @transform_1, window_bounds = array<i64: 256, 128>}, {pipeline_mode = #tpu.pipeline_mode<synchronous>, transform_indices = @transform_2, window_bounds = array<i64: 1, 128>}, {transform_indices = @transform_3, window_bounds = array<i64: 128, 128>}]} {
    %c0 = arith.constant 0 : index
    %c0_0 = arith.constant 0 : index
    %0 = vector.load %arg1[%c0, %c0_0] : memref<128x256xbf16, #tpu.memory_space<vmem>>, vector<128x256xbf16>
    %c0_1 = arith.constant 0 : index
    %c0_2 = arith.constant 0 : index
    %1 = vector.load %arg2[%c0_1, %c0_2] : memref<256x128xbf16, #tpu.memory_space<vmem>>, vector<256x128xbf16>
    %cst = arith.constant dense<0.000000e+00> : vector<128x128xf32>
    %2 = tpu.matmul %0, %1, %cst {dimension_numbers = #tpu.dot_dimension_numbers<[1], [0], [0], [1], [0, 0, 1, 1], [], []>} : vector<128x256xbf16>, vector<256x128xbf16>, vector<128x128xf32> -> vector<128x128xf32>
    %c0_3 = arith.constant 0 : index
    %c0_4 = arith.constant 0 : index
    %3 = vector.load %arg3[%c0_3, %c0_4] : memref<1x128xf32, #tpu.memory_space<vmem>>, vector<1x128xf32>
    %4 = vector.broadcast %3 : vector<1x128xf32> to vector<128x128xf32>
    %5 = arith.addf %2, %4 : vector<128x128xf32>
    %6 = arith.negf %5 : vector<128x128xf32>
    %7 = math.exp %6 : vector<128x128xf32>
    %cst_5 = arith.constant 1.000000e+00 : f32
    %8 = vector.broadcast %cst_5 : f32 to vector<128x128xf32>
    %9 = arith.addf %8, %7 : vector<128x128xf32>
    %10 = arith.divf %8, %9 : vector<128x128xf32>
    %c0_6 = arith.constant 0 : index
    %c0_7 = arith.constant 0 : index
    %11 = vector.load %arg4[%c0_6, %c0_7] : memref<128x128xf32, #tpu.memory_space<vmem>>, vector<128x128xf32>
    tpu.vector_store %arg4[%c0_6, %c0_7], %10 {strides = array<i32>} : memref<128x128xf32, #tpu.memory_space<vmem>>, vector<128x128xf32>,
    return
  }
  func.func @transform_0(%arg0: i32) -> (i32, i32) {
    %c0_i32 = arith.constant 0 : i32
    %c0_i32_0 = arith.constant 0 : i32
    return %arg0, %c0_i32 : i32, i32
  }
  func.func @transform_1(%arg0: i32) -> (i32, i32) {
    %c0_i32 = arith.constant 0 : i32
    %c0_i32_0 = arith.constant 0 : i32
    %c0_i32_1 = arith.constant 0 : i32
    return %c0_i32, %c0_i32_0 : i32, i32
  }
  func.func @transform_2(%arg0: i32) -> (i32, i32) {
    %c0_i32 = arith.constant 0 : i32
    %c0_i32_0 = arith.constant 0 : i32
    %c0_i32_1 = arith.constant 0 : i32
    return %c0_i32, %c0_i32_0 : i32, i32
  }
  func.func @transform_3(%arg0: i32) -> (i32, i32) {
    %c0_i32 = arith.constant 0 : i32
    %c0_i32_0 = arith.constant 0 : i32
    return %arg0, %c0_i32 : i32, i32
  }
}

module attributes {stable_mosaic.version = 11 : i64} {
  func.func @_matmul_kernel(%arg0: i32, %arg1: memref<8x128xbf16, #tpu.memory_space<vmem>>, %arg2: memref<128x128xbf16, #tpu.memory_space<vmem>>, %arg3: memref<1x128xf32, #tpu.memory_space<vmem>>, %arg4: memref<8x128xf32, #tpu.memory_space<vmem>>) attributes {dimension_semantics = [#tpu.dimension_semantics<parallel>], iteration_bounds = array<i64: 1>, scalar_prefetch = 0 : i64, scratch_operands = 0 : i64, tpu.core_type = #tpu.core_type<tc>, window_params = [{transform_indices = @transform_0, window_bounds = array<i64: 8, 128>}, {pipeline_mode = #tpu.pipeline_mode<synchronous>, transform_indices = @transform_1, window_bounds = array<i64: 128, 128>}, {pipeline_mode = #tpu.pipeline_mode<synchronous>, transform_indices = @transform_2, window_bounds = array<i64: 1, 128>}, {transform_indices = @transform_3, window_bounds = array<i64: 8, 128>}]} {
    %c0 = arith.constant 0 : index
    %c0_0 = arith.constant 0 : index
    %0 = vector.load %arg1[%c0, %c0_0] : memref<8x128xbf16, #tpu.memory_space<vmem>>, vector<8x128xbf16>
    %c0_1 = arith.constant 0 : index
    %c0_2 = arith.constant 0 : index
    %1 = vector.load %arg2[%c0_1, %c0_2] : memref<128x128xbf16, #tpu.memory_space<vmem>>, vector<128x128xbf16>
    %cst = arith.constant dense<0.000000e+00> : vector<8x128xf32>
    %2 = tpu.matmul %0, %1, %cst {dimension_numbers = #tpu.dot_dimension_numbers<[1], [0], [0], [1], [0, 0, 1, 1], [], []>} : vector<8x128xbf16>, vector<128x128xbf16>, vector<8x128xf32> -> vector<8x128xf32>
    %c0_3 = arith.constant 0 : index
    %c0_4 = arith.constant 0 : index
    %3 = vector.load %arg3[%c0_3, %c0_4] : memref<1x128xf32, #tpu.memory_space<vmem>>, vector<1x128xf32>
    %4 = vector.broadcast %3 : vector<1x128xf32> to vector<8x128xf32>
    %5 = arith.addf %2, %4 : vector<8x128xf32>
    %c0_5 = arith.constant 0 : index
    %c0_6 = arith.constant 0 : index
    %6 = vector.load %arg4[%c0_5, %c0_6] : memref<8x128xf32, #tpu.memory_space<vmem>>, vector<8x128xf32>
    tpu.vector_store %arg4[%c0_5, %c0_6], %5 {strides = array<i32>} : memref<8x128xf32, #tpu.memory_space<vmem>>, vector<8x128xf32>,
    return
  }
  func.func @transform_0(%arg0: i32) -> (i32, i32) {
    %c0_i32 = arith.constant 0 : i32
    %c0_i32_0 = arith.constant 0 : i32
    return %arg0, %c0_i32 : i32, i32
  }
  func.func @transform_1(%arg0: i32) -> (i32, i32) {
    %c0_i32 = arith.constant 0 : i32
    %c0_i32_0 = arith.constant 0 : i32
    %c0_i32_1 = arith.constant 0 : i32
    return %c0_i32, %c0_i32_0 : i32, i32
  }
  func.func @transform_2(%arg0: i32) -> (i32, i32) {
    %c0_i32 = arith.constant 0 : i32
    %c0_i32_0 = arith.constant 0 : i32
    %c0_i32_1 = arith.constant 0 : i32
    return %c0_i32, %c0_i32_0 : i32, i32
  }
  func.func @transform_3(%arg0: i32) -> (i32, i32) {
    %c0_i32 = arith.constant 0 : i32
    %c0_i32_0 = arith.constant 0 : i32
    return %arg0, %c0_i32 : i32, i32
  }
}

module attributes {stable_mosaic.version = 11 : i64} {
  func.func @_render_kernel(%arg0: i32, %arg1: i32, %arg2: memref<1x3x256xf32, #tpu.memory_space<vmem>>, %arg3: memref<1x8x256xf32, #tpu.memory_space<vmem>>, %arg4: memref<1x8x3xf32, #tpu.memory_space<vmem>>, %arg5: memref<1x3x256xf32, #tpu.memory_space<vmem>>, %arg6: memref<1x8x3x256xbf16, #tpu.memory_space<vmem>>) attributes {dimension_semantics = [#tpu.dimension_semantics<parallel>, #tpu.dimension_semantics<parallel>], iteration_bounds = array<i64: 2, 1>, scalar_prefetch = 0 : i64, scratch_operands = 0 : i64, tpu.core_type = #tpu.core_type<tc>, window_params = [{transform_indices = @transform_0, window_bounds = array<i64: 1, 3, 256>}, {transform_indices = @transform_1, window_bounds = array<i64: 1, 8, 256>}, {transform_indices = @transform_2, window_bounds = array<i64: 1, 8, 3>}, {transform_indices = @transform_3, window_bounds = array<i64: 1, 3, 256>}, {transform_indices = @transform_4, window_bounds = array<i64: 1, 8, 3, 256>}]} {
    %c0 = arith.constant 0 : index
    %c0_0 = arith.constant 0 : index
    %c0_1 = arith.constant 0 : index
    %0 = vector.load %arg2[%c0, %c0_0, %c0_1] : memref<1x3x256xf32, #tpu.memory_space<vmem>>, vector<1x3x256xf32>
    %1 = vector.shape_cast %0 : vector<1x3x256xf32> to vector<3x256xf32>
    %c0_2 = arith.constant 0 : index
    %c0_3 = arith.constant 0 : index
    %c0_4 = arith.constant 0 : index
    %2 = vector.load %arg3[%c0_2, %c0_3, %c0_4] : memref<1x8x256xf32, #tpu.memory_space<vmem>>, vector<1x8x256xf32>
    %3 = vector.shape_cast %2 : vector<1x8x256xf32> to vector<8x256xf32>
    %c0_5 = arith.constant 0 : index
    %c0_6 = arith.constant 0 : index
    %c0_7 = arith.constant 0 : index
    %4 = vector.load %arg4[%c0_5, %c0_6, %c0_7] : memref<1x8x3xf32, #tpu.memory_space<vmem>>, vector<1x8x3xf32>
    %5 = vector.shape_cast %4 : vector<1x8x3xf32> to vector<8x3xf32>
    %6 = math.tanh %5 : vector<8x3xf32>
    %cst = arith.constant 0.000000e+00 : f32
    %7 = vector.broadcast %cst : f32 to vector<3x256xf32>
    %8 = vector.extract_strided_slice %6 {offsets = [0, 0], sizes = [1, 3], strides = [1, 1]} : vector<8x3xf32> to vector<1x3xf32>
    %9 = vector.shape_cast %8 : vector<1x3xf32> to vector<3xf32>
    %10 = vector.shape_cast %9 : vector<3xf32> to vector<3x1xf32>
    %11 = vector.extract_strided_slice %3 {offsets = [0, 0], sizes = [1, 256], strides = [1, 1]} : vector<8x256xf32> to vector<1x256xf32>
    %12 = vector.shape_cast %11 : vector<1x256xf32> to vector<256xf32>
    %13 = vector.shape_cast %12 : vector<256xf32> to vector<1x256xf32>
    %14 = vector.broadcast %10 : vector<3x1xf32> to vector<3x256xf32>
    %15 = vector.broadcast %13 : vector<1x256xf32> to vector<3x256xf32>
    %16 = arith.mulf %14, %15 : vector<3x256xf32>
    %cst_8 = arith.constant 1.000000e+00 : f32
    %17 = vector.broadcast %cst_8 : f32 to vector<3x256xf32>
    %18 = arith.addf %17, %16 : vector<3x256xf32>
    %19 = arith.mulf %1, %18 : vector<3x256xf32>
    %cst_9 = arith.constant 0.000000e+00 : f32
    %cst_10 = arith.constant 1.000000e+00 : f32
    %20 = vector.broadcast %cst_9 : f32 to vector<3x256xf32>
    %21 = arith.maximumf %20, %19 : vector<3x256xf32>
    %22 = vector.broadcast %cst_10 : f32 to vector<3x256xf32>
    %23 = arith.minimumf %22, %21 : vector<3x256xf32>
    %24 = arith.truncf %23 : vector<3x256xf32> to vector<3x256xbf16>
    %c0_11 = arith.constant 0 : index
    %c0_12 = arith.constant 0 : index
    %c0_13 = arith.constant 0 : index
    %c0_14 = arith.constant 0 : index
    %25 = vector.load %arg6[%c0_11, %c0_12, %c0_13, %c0_14] : memref<1x8x3x256xbf16, #tpu.memory_space<vmem>>, vector<1x1x3x256xbf16>
    %26 = vector.shape_cast %25 : vector<1x1x3x256xbf16> to vector<3x256xbf16>
    %27 = vector.shape_cast %24 : vector<3x256xbf16> to vector<1x1x3x256xbf16>
    tpu.vector_store %arg6[%c0_11, %c0_12, %c0_13, %c0_14], %27 {strides = array<i32>} : memref<1x8x3x256xbf16, #tpu.memory_space<vmem>>, vector<1x1x3x256xbf16>,
    %28 = arith.addf %7, %16 : vector<3x256xf32>
    %29 = vector.extract_strided_slice %6 {offsets = [1, 0], sizes = [1, 3], strides = [1, 1]} : vector<8x3xf32> to vector<1x3xf32>
    %30 = vector.shape_cast %29 : vector<1x3xf32> to vector<3xf32>
    %31 = vector.shape_cast %30 : vector<3xf32> to vector<3x1xf32>
    %32 = vector.extract_strided_slice %3 {offsets = [1, 0], sizes = [1, 256], strides = [1, 1]} : vector<8x256xf32> to vector<1x256xf32>
    %33 = vector.shape_cast %32 : vector<1x256xf32> to vector<256xf32>
    %34 = vector.shape_cast %33 : vector<256xf32> to vector<1x256xf32>
    %35 = vector.broadcast %31 : vector<3x1xf32> to vector<3x256xf32>
    %36 = vector.broadcast %34 : vector<1x256xf32> to vector<3x256xf32>
    %37 = arith.mulf %35, %36 : vector<3x256xf32>
    %cst_15 = arith.constant 1.000000e+00 : f32
    %38 = vector.broadcast %cst_15 : f32 to vector<3x256xf32>
    %39 = arith.addf %38, %37 : vector<3x256xf32>
    %40 = arith.mulf %1, %39 : vector<3x256xf32>
    %cst_16 = arith.constant 0.000000e+00 : f32
    %cst_17 = arith.constant 1.000000e+00 : f32
    %41 = vector.broadcast %cst_16 : f32 to vector<3x256xf32>
    %42 = arith.maximumf %41, %40 : vector<3x256xf32>
    %43 = vector.broadcast %cst_17 : f32 to vector<3x256xf32>
    %44 = arith.minimumf %43, %42 : vector<3x256xf32>
    %45 = arith.truncf %44 : vector<3x256xf32> to vector<3x256xbf16>
    %c0_18 = arith.constant 0 : index
    %c1 = arith.constant 1 : index
    %c0_19 = arith.constant 0 : index
    %c0_20 = arith.constant 0 : index
    %46 = vector.load %arg6[%c0_18, %c1, %c0_19, %c0_20] : memref<1x8x3x256xbf16, #tpu.memory_space<vmem>>, vector<1x1x3x256xbf16>
    %47 = vector.shape_cast %46 : vector<1x1x3x256xbf16> to vector<3x256xbf16>
    %48 = vector.shape_cast %45 : vector<3x256xbf16> to vector<1x1x3x256xbf16>
    tpu.vector_store %arg6[%c0_18, %c1, %c0_19, %c0_20], %48 {strides = array<i32>} : memref<1x8x3x256xbf16, #tpu.memory_space<vmem>>, vector<1x1x3x256xbf16>,
    %49 = arith.addf %28, %37 : vector<3x256xf32>
    %50 = vector.extract_strided_slice %6 {offsets = [2, 0], sizes = [1, 3], strides = [1, 1]} : vector<8x3xf32> to vector<1x3xf32>
    %51 = vector.shape_cast %50 : vector<1x3xf32> to vector<3xf32>
    %52 = vector.shape_cast %51 : vector<3xf32> to vector<3x1xf32>
    %53 = vector.extract_strided_slice %3 {offsets = [2, 0], sizes = [1, 256], strides = [1, 1]} : vector<8x256xf32> to vector<1x256xf32>
    %54 = vector.shape_cast %53 : vector<1x256xf32> to vector<256xf32>
    %55 = vector.shape_cast %54 : vector<256xf32> to vector<1x256xf32>
    %56 = vector.broadcast %52 : vector<3x1xf32> to vector<3x256xf32>
    %57 = vector.broadcast %55 : vector<1x256xf32> to vector<3x256xf32>
    %58 = arith.mulf %56, %57 : vector<3x256xf32>
    %cst_21 = arith.constant 1.000000e+00 : f32
    %59 = vector.broadcast %cst_21 : f32 to vector<3x256xf32>
    %60 = arith.addf %59, %58 : vector<3x256xf32>
    %61 = arith.mulf %1, %60 : vector<3x256xf32>
    %cst_22 = arith.constant 0.000000e+00 : f32
    %cst_23 = arith.constant 1.000000e+00 : f32
    %62 = vector.broadcast %cst_22 : f32 to vector<3x256xf32>
    %63 = arith.maximumf %62, %61 : vector<3x256xf32>
    %64 = vector.broadcast %cst_23 : f32 to vector<3x256xf32>
    %65 = arith.minimumf %64, %63 : vector<3x256xf32>
    %66 = arith.truncf %65 : vector<3x256xf32> to vector<3x256xbf16>
    %c0_24 = arith.constant 0 : index
    %c2 = arith.constant 2 : index
    %c0_25 = arith.constant 0 : index
    %c0_26 = arith.constant 0 : index
    %67 = vector.load %arg6[%c0_24, %c2, %c0_25, %c0_26] : memref<1x8x3x256xbf16, #tpu.memory_space<vmem>>, vector<1x1x3x256xbf16>
    %68 = vector.shape_cast %67 : vector<1x1x3x256xbf16> to vector<3x256xbf16>
    %69 = vector.shape_cast %66 : vector<3x256xbf16> to vector<1x1x3x256xbf16>
    tpu.vector_store %arg6[%c0_24, %c2, %c0_25, %c0_26], %69 {strides = array<i32>} : memref<1x8x3x256xbf16, #tpu.memory_space<vmem>>, vector<1x1x3x256xbf16>,
    %70 = arith.addf %49, %58 : vector<3x256xf32>
    %71 = vector.extract_strided_slice %6 {offsets = [3, 0], sizes = [1, 3], strides = [1, 1]} : vector<8x3xf32> to vector<1x3xf32>
    %72 = vector.shape_cast %71 : vector<1x3xf32> to vector<3xf32>
    %73 = vector.shape_cast %72 : vector<3xf32> to vector<3x1xf32>
    %74 = vector.extract_strided_slice %3 {offsets = [3, 0], sizes = [1, 256], strides = [1, 1]} : vector<8x256xf32> to vector<1x256xf32>
    %75 = vector.shape_cast %74 : vector<1x256xf32> to vector<256xf32>
    %76 = vector.shape_cast %75 : vector<256xf32> to vector<1x256xf32>
    %77 = vector.broadcast %73 : vector<3x1xf32> to vector<3x256xf32>
    %78 = vector.broadcast %76 : vector<1x256xf32> to vector<3x256xf32>
    %79 = arith.mulf %77, %78 : vector<3x256xf32>
    %cst_27 = arith.constant 1.000000e+00 : f32
    %80 = vector.broadcast %cst_27 : f32 to vector<3x256xf32>
    %81 = arith.addf %80, %79 : vector<3x256xf32>
    %82 = arith.mulf %1, %81 : vector<3x256xf32>
    %cst_28 = arith.constant 0.000000e+00 : f32
    %cst_29 = arith.constant 1.000000e+00 : f32
    %83 = vector.broadcast %cst_28 : f32 to vector<3x256xf32>
    %84 = arith.maximumf %83, %82 : vector<3x256xf32>
    %85 = vector.broadcast %cst_29 : f32 to vector<3x256xf32>
    %86 = arith.minimumf %85, %84 : vector<3x256xf32>
    %87 = arith.truncf %86 : vector<3x256xf32> to vector<3x256xbf16>
    %c0_30 = arith.constant 0 : index
    %c3 = arith.constant 3 : index
    %c0_31 = arith.constant 0 : index
    %c0_32 = arith.constant 0 : index
    %88 = vector.load %arg6[%c0_30, %c3, %c0_31, %c0_32] : memref<1x8x3x256xbf16, #tpu.memory_space<vmem>>, vector<1x1x3x256xbf16>
    %89 = vector.shape_cast %88 : vector<1x1x3x256xbf16> to vector<3x256xbf16>
    %90 = vector.shape_cast %87 : vector<3x256xbf16> to vector<1x1x3x256xbf16>
    tpu.vector_store %arg6[%c0_30, %c3, %c0_31, %c0_32], %90 {strides = array<i32>} : memref<1x8x3x256xbf16, #tpu.memory_space<vmem>>, vector<1x1x3x256xbf16>,
    %91 = arith.addf %70, %79 : vector<3x256xf32>
    %92 = vector.extract_strided_slice %6 {offsets = [4, 0], sizes = [1, 3], strides = [1, 1]} : vector<8x3xf32> to vector<1x3xf32>
    %93 = vector.shape_cast %92 : vector<1x3xf32> to vector<3xf32>
    %94 = vector.shape_cast %93 : vector<3xf32> to vector<3x1xf32>
    %95 = vector.extract_strided_slice %3 {offsets = [4, 0], sizes = [1, 256], strides = [1, 1]} : vector<8x256xf32> to vector<1x256xf32>
    %96 = vector.shape_cast %95 : vector<1x256xf32> to vector<256xf32>
    %97 = vector.shape_cast %96 : vector<256xf32> to vector<1x256xf32>
    %98 = vector.broadcast %94 : vector<3x1xf32> to vector<3x256xf32>
    %99 = vector.broadcast %97 : vector<1x256xf32> to vector<3x256xf32>
    %100 = arith.mulf %98, %99 : vector<3x256xf32>
    %cst_33 = arith.constant 1.000000e+00 : f32
    %101 = vector.broadcast %cst_33 : f32 to vector<3x256xf32>
    %102 = arith.addf %101, %100 : vector<3x256xf32>
    %103 = arith.mulf %1, %102 : vector<3x256xf32>
    %cst_34 = arith.constant 0.000000e+00 : f32
    %cst_35 = arith.constant 1.000000e+00 : f32
    %104 = vector.broadcast %cst_34 : f32 to vector<3x256xf32>
    %105 = arith.maximumf %104, %103 : vector<3x256xf32>
    %106 = vector.broadcast %cst_35 : f32 to vector<3x256xf32>
    %107 = arith.minimumf %106, %105 : vector<3x256xf32>
    %108 = arith.truncf %107 : vector<3x256xf32> to vector<3x256xbf16>
    %c0_36 = arith.constant 0 : index
    %c4 = arith.constant 4 : index
    %c0_37 = arith.constant 0 : index
    %c0_38 = arith.constant 0 : index
    %109 = vector.load %arg6[%c0_36, %c4, %c0_37, %c0_38] : memref<1x8x3x256xbf16, #tpu.memory_space<vmem>>, vector<1x1x3x256xbf16>
    %110 = vector.shape_cast %109 : vector<1x1x3x256xbf16> to vector<3x256xbf16>
    %111 = vector.shape_cast %108 : vector<3x256xbf16> to vector<1x1x3x256xbf16>
    tpu.vector_store %arg6[%c0_36, %c4, %c0_37, %c0_38], %111 {strides = array<i32>} : memref<1x8x3x256xbf16, #tpu.memory_space<vmem>>, vector<1x1x3x256xbf16>,
    %112 = arith.addf %91, %100 : vector<3x256xf32>
    %113 = vector.extract_strided_slice %6 {offsets = [5, 0], sizes = [1, 3], strides = [1, 1]} : vector<8x3xf32> to vector<1x3xf32>
    %114 = vector.shape_cast %113 : vector<1x3xf32> to vector<3xf32>
    %115 = vector.shape_cast %114 : vector<3xf32> to vector<3x1xf32>
    %116 = vector.extract_strided_slice %3 {offsets = [5, 0], sizes = [1, 256], strides = [1, 1]} : vector<8x256xf32> to vector<1x256xf32>
    %117 = vector.shape_cast %116 : vector<1x256xf32> to vector<256xf32>
    %118 = vector.shape_cast %117 : vector<256xf32> to vector<1x256xf32>
    %119 = vector.broadcast %115 : vector<3x1xf32> to vector<3x256xf32>
    %120 = vector.broadcast %118 : vector<1x256xf32> to vector<3x256xf32>
    %121 = arith.mulf %119, %120 : vector<3x256xf32>
    %cst_39 = arith.constant 1.000000e+00 : f32
    %122 = vector.broadcast %cst_39 : f32 to vector<3x256xf32>
    %123 = arith.addf %122, %121 : vector<3x256xf32>
    %124 = arith.mulf %1, %123 : vector<3x256xf32>
    %cst_40 = arith.constant 0.000000e+00 : f32
    %cst_41 = arith.constant 1.000000e+00 : f32
    %125 = vector.broadcast %cst_40 : f32 to vector<3x256xf32>
    %126 = arith.maximumf %125, %124 : vector<3x256xf32>
    %127 = vector.broadcast %cst_41 : f32 to vector<3x256xf32>
    %128 = arith.minimumf %127, %126 : vector<3x256xf32>
    %129 = arith.truncf %128 : vector<3x256xf32> to vector<3x256xbf16>
    %c0_42 = arith.constant 0 : index
    %c5 = arith.constant 5 : index
    %c0_43 = arith.constant 0 : index
    %c0_44 = arith.constant 0 : index
    %130 = vector.load %arg6[%c0_42, %c5, %c0_43, %c0_44] : memref<1x8x3x256xbf16, #tpu.memory_space<vmem>>, vector<1x1x3x256xbf16>
    %131 = vector.shape_cast %130 : vector<1x1x3x256xbf16> to vector<3x256xbf16>
    %132 = vector.shape_cast %129 : vector<3x256xbf16> to vector<1x1x3x256xbf16>
    tpu.vector_store %arg6[%c0_42, %c5, %c0_43, %c0_44], %132 {strides = array<i32>} : memref<1x8x3x256xbf16, #tpu.memory_space<vmem>>, vector<1x1x3x256xbf16>,
    %133 = arith.addf %112, %121 : vector<3x256xf32>
    %134 = vector.extract_strided_slice %6 {offsets = [6, 0], sizes = [1, 3], strides = [1, 1]} : vector<8x3xf32> to vector<1x3xf32>
    %135 = vector.shape_cast %134 : vector<1x3xf32> to vector<3xf32>
    %136 = vector.shape_cast %135 : vector<3xf32> to vector<3x1xf32>
    %137 = vector.extract_strided_slice %3 {offsets = [6, 0], sizes = [1, 256], strides = [1, 1]} : vector<8x256xf32> to vector<1x256xf32>
    %138 = vector.shape_cast %137 : vector<1x256xf32> to vector<256xf32>
    %139 = vector.shape_cast %138 : vector<256xf32> to vector<1x256xf32>
    %140 = vector.broadcast %136 : vector<3x1xf32> to vector<3x256xf32>
    %141 = vector.broadcast %139 : vector<1x256xf32> to vector<3x256xf32>
    %142 = arith.mulf %140, %141 : vector<3x256xf32>
    %cst_45 = arith.constant 1.000000e+00 : f32
    %143 = vector.broadcast %cst_45 : f32 to vector<3x256xf32>
    %144 = arith.addf %143, %142 : vector<3x256xf32>
    %145 = arith.mulf %1, %144 : vector<3x256xf32>
    %cst_46 = arith.constant 0.000000e+00 : f32
    %cst_47 = arith.constant 1.000000e+00 : f32
    %146 = vector.broadcast %cst_46 : f32 to vector<3x256xf32>
    %147 = arith.maximumf %146, %145 : vector<3x256xf32>
    %148 = vector.broadcast %cst_47 : f32 to vector<3x256xf32>
    %149 = arith.minimumf %148, %147 : vector<3x256xf32>
    %150 = arith.truncf %149 : vector<3x256xf32> to vector<3x256xbf16>
    %c0_48 = arith.constant 0 : index
    %c6 = arith.constant 6 : index
    %c0_49 = arith.constant 0 : index
    %c0_50 = arith.constant 0 : index
    %151 = vector.load %arg6[%c0_48, %c6, %c0_49, %c0_50] : memref<1x8x3x256xbf16, #tpu.memory_space<vmem>>, vector<1x1x3x256xbf16>
    %152 = vector.shape_cast %151 : vector<1x1x3x256xbf16> to vector<3x256xbf16>
    %153 = vector.shape_cast %150 : vector<3x256xbf16> to vector<1x1x3x256xbf16>
    tpu.vector_store %arg6[%c0_48, %c6, %c0_49, %c0_50], %153 {strides = array<i32>} : memref<1x8x3x256xbf16, #tpu.memory_space<vmem>>, vector<1x1x3x256xbf16>,
    %154 = arith.addf %133, %142 : vector<3x256xf32>
    %155 = vector.extract_strided_slice %6 {offsets = [7, 0], sizes = [1, 3], strides = [1, 1]} : vector<8x3xf32> to vector<1x3xf32>
    %156 = vector.shape_cast %155 : vector<1x3xf32> to vector<3xf32>
    %157 = vector.shape_cast %156 : vector<3xf32> to vector<3x1xf32>
    %158 = vector.extract_strided_slice %3 {offsets = [7, 0], sizes = [1, 256], strides = [1, 1]} : vector<8x256xf32> to vector<1x256xf32>
    %159 = vector.shape_cast %158 : vector<1x256xf32> to vector<256xf32>
    %160 = vector.shape_cast %159 : vector<256xf32> to vector<1x256xf32>
    %161 = vector.broadcast %157 : vector<3x1xf32> to vector<3x256xf32>
    %162 = vector.broadcast %160 : vector<1x256xf32> to vector<3x256xf32>
    %163 = arith.mulf %161, %162 : vector<3x256xf32>
    %cst_51 = arith.constant 1.000000e+00 : f32
    %164 = vector.broadcast %cst_51 : f32 to vector<3x256xf32>
    %165 = arith.addf %164, %163 : vector<3x256xf32>
    %166 = arith.mulf %1, %165 : vector<3x256xf32>
    %cst_52 = arith.constant 0.000000e+00 : f32
    %cst_53 = arith.constant 1.000000e+00 : f32
    %167 = vector.broadcast %cst_52 : f32 to vector<3x256xf32>
    %168 = arith.maximumf %167, %166 : vector<3x256xf32>
    %169 = vector.broadcast %cst_53 : f32 to vector<3x256xf32>
    %170 = arith.minimumf %169, %168 : vector<3x256xf32>
    %171 = arith.truncf %170 : vector<3x256xf32> to vector<3x256xbf16>
    %c0_54 = arith.constant 0 : index
    %c7 = arith.constant 7 : index
    %c0_55 = arith.constant 0 : index
    %c0_56 = arith.constant 0 : index
    %172 = vector.load %arg6[%c0_54, %c7, %c0_55, %c0_56] : memref<1x8x3x256xbf16, #tpu.memory_space<vmem>>, vector<1x1x3x256xbf16>
    %173 = vector.shape_cast %172 : vector<1x1x3x256xbf16> to vector<3x256xbf16>
    %174 = vector.shape_cast %171 : vector<3x256xbf16> to vector<1x1x3x256xbf16>
    tpu.vector_store %arg6[%c0_54, %c7, %c0_55, %c0_56], %174 {strides = array<i32>} : memref<1x8x3x256xbf16, #tpu.memory_space<vmem>>, vector<1x1x3x256xbf16>,
    %175 = arith.addf %154, %163 : vector<3x256xf32>
    %cst_57 = arith.constant 1.000000e+00 : f32
    %176 = vector.broadcast %cst_57 : f32 to vector<3x256xf32>
    %177 = arith.addf %176, %175 : vector<3x256xf32>
    %178 = arith.mulf %1, %177 : vector<3x256xf32>
    %cst_58 = arith.constant 0.000000e+00 : f32
    %cst_59 = arith.constant 1.000000e+00 : f32
    %179 = vector.broadcast %cst_58 : f32 to vector<3x256xf32>
    %180 = arith.maximumf %179, %178 : vector<3x256xf32>
    %181 = vector.broadcast %cst_59 : f32 to vector<3x256xf32>
    %182 = arith.minimumf %181, %180 : vector<3x256xf32>
    %c0_60 = arith.constant 0 : index
    %c0_61 = arith.constant 0 : index
    %c0_62 = arith.constant 0 : index
    %183 = vector.load %arg5[%c0_60, %c0_61, %c0_62] : memref<1x3x256xf32, #tpu.memory_space<vmem>>, vector<1x3x256xf32>
    %184 = vector.shape_cast %183 : vector<1x3x256xf32> to vector<3x256xf32>
    %185 = vector.shape_cast %182 : vector<3x256xf32> to vector<1x3x256xf32>
    tpu.vector_store %arg5[%c0_60, %c0_61, %c0_62], %185 {strides = array<i32>} : memref<1x3x256xf32, #tpu.memory_space<vmem>>, vector<1x3x256xf32>,
    return
  }
  func.func @transform_0(%arg0: i32, %arg1: i32) -> (i32, i32, i32) {
    %c0_i32 = arith.constant 0 : i32
    %c0_i32_0 = arith.constant 0 : i32
    return %arg0, %c0_i32, %arg1 : i32, i32, i32
  }
  func.func @transform_1(%arg0: i32, %arg1: i32) -> (i32, i32, i32) {
    %c0_i32 = arith.constant 0 : i32
    %c0_i32_0 = arith.constant 0 : i32
    return %arg0, %c0_i32, %arg1 : i32, i32, i32
  }
  func.func @transform_2(%arg0: i32, %arg1: i32) -> (i32, i32, i32) {
    %c0_i32 = arith.constant 0 : i32
    %c0_i32_0 = arith.constant 0 : i32
    %c0_i32_1 = arith.constant 0 : i32
    return %arg0, %c0_i32, %c0_i32_0 : i32, i32, i32
  }
  func.func @transform_3(%arg0: i32, %arg1: i32) -> (i32, i32, i32) {
    %c0_i32 = arith.constant 0 : i32
    %c0_i32_0 = arith.constant 0 : i32
    return %arg0, %c0_i32, %arg1 : i32, i32, i32
  }
  func.func @transform_4(%arg0: i32, %arg1: i32) -> (i32, i32, i32, i32) {
    %c0_i32 = arith.constant 0 : i32
    %c0_i32_0 = arith.constant 0 : i32
    %c0_i32_1 = arith.constant 0 : i32
    return %arg0, %c0_i32, %c0_i32_0, %arg1 : i32, i32, i32, i32
  }
}

</mosaic_0001>

<bundles_post_ra>
// kernel: rsfnet_forward.5
= control target key start
LH: loop header
LB: loop body
LE: loop exit
PB: predicated region body
PF: predicated region fallthrough
CT: control target
= control target key end

     0   :  { %s1860_s1 = inlined_call_operand.vmem [shape: bf16[128,128], index: 1, kind: input, shape index: {}]   ;;  %s1861_s0 = inlined_call_operand.vmem [shape: bf16[512,128], index: 0, kind: input, shape index: {}]   ;;  %s1862_s2 = inlined_call_operand.vmem [shape: f32[1,128], index: 2, kind: input, shape index: {}]   ;;  %s1863_s3 = inlined_call_operand.vmem [shape: bf16[512,128], index: 3, kind: output, shape index: {}]  }
   0x1   :  { %v1515_v0 = vld [vmem:[%s1860_s1 + $0x38] sm:$0xff]   ;;  %v1516_v1 = vld [vmem:[%s1860_s1 + $0x30] sm:$0xff]   ;;  %v1517_v2 = vld [vmem:[%s1860_s1 + $0x28] sm:$0xff]  }
   0x2   :  { %1419 = vmatprep.subr.bf16.mxu0 %v1515_v0  ;;  %1499 = vmatprep.subr.bf16.mxu1 %v1515_v0  ;;  %v1518_v3 = vld [vmem:[%s1860_s1 + $0x20] sm:$0xff]   ;;  %v1519_v6 = vld [vmem:[%s1860_s1 + $0x18] sm:$0xff]   ;;  %v1520_v7 = vld [vmem:[%s1860_s1 + $0x10] sm:$0xff]  }
   0x3   :  { %1420 = vmatpush3.bf16.msra.mxu0 %v1515_v0  ;;  %1507 = vmatpush3.bf16.msra.mxu1 %v1515_v0  ;;  %v1523_v4 = vld [vmem:[%s1861_s0] sm:$0xff]   ;;  %v1521_v8 = vld [vmem:[%s1860_s1 + $0x8] sm:$0xff]   ;;  %v1527_v12 = vld [vmem:[%s1861_s0 + $0x10] sm:$0xff]  }
   0x4   :  { %1421 = vmatprep.subr.bf16.mxu0 %v1516_v1  ;;  %1500 = vmatprep.subr.bf16.mxu1 %v1516_v1  ;;  %v1524_v5 = vld [vmem:[%s1861_s0 + $0x80] sm:$0xff]   ;;  %v1525_v10 = vld [vmem:[%s1861_s0 + $0x8] sm:$0xff]   ;;  %v1528_v13 = vld [vmem:[%s1861_s0 + $0x90] sm:$0xff]  }
   0x5   :  { %1435 = vmatprep.mubr.bf16.mxu0 %v1523_v4  ;;  %1467 = vmatprep.mubr.bf16.mxu1 %v1524_v5  ;;  %v1522_v9 = vld [vmem:[%s1860_s1] sm:$0xff]   ;;  %v1526_v11 = vld [vmem:[%s1861_s0 + $0x88] sm:$0xff]   ;;  %v1529_v14 = vld [vmem:[%s1861_s0 + $0x18] sm:$0xff]  }
   0x6   :  { %v1530_v15 = vld [vmem:[%s1861_s0 + $0x98] sm:$0xff]   ;;  %v1531_v16 = vld [vmem:[%s1861_s0 + $0x20] sm:$0xff]   ;;  %v1533_v18 = vld [vmem:[%s1861_s0 + $0x28] sm:$0xff]  }
   0x7   :  { %1422 = vmatpush3.bf16.msra.mxu0 %v1516_v1  ;;  %1508 = vmatpush3.bf16.msra.mxu1 %v1516_v1  ;;  %v1532_v17 = vld [vmem:[%s1861_s0 + $0xa0] sm:$0xff]   ;;  %v1534_v19 = vld [vmem:[%s1861_s0 + $0xa8] sm:$0xff]   ;;  %v1535_v20 = vld [vmem:[%s1861_s0 + $0x30] sm:$0xff]  }
   0x8   :  { %1423 = vmatprep.subr.bf16.mxu0 %v1517_v2  ;;  %1501 = vmatprep.subr.bf16.mxu1 %v1517_v2  ;;  %v1536_v21 = vld [vmem:[%s1861_s0 + $0xb0] sm:$0xff]   ;;  %v1537_v22 = vld [vmem:[%s1861_s0 + $0x38] sm:$0xff]   ;;  %v1539_v24 = vld [vmem:[%s1861_s0 + $0x40] sm:$0xff]  }
   0x9   :  { %v1538_v23 = vld [vmem:[%s1861_s0 + $0xb8] sm:$0xff]   ;;  %v1540_v25 = vld [vmem:[%s1861_s0 + $0xc0] sm:$0xff]   ;;  %v1541_v26 = vld [vmem:[%s1861_s0 + $0x48] sm:$0xff]  }
   0xa   :  { %v1542_v27 = vld [vmem:[%s1861_s0 + $0xc8] sm:$0xff]   ;;  %v1543_v28 = vld [vmem:[%s1861_s0 + $0x50] sm:$0xff]   ;;  %v1545_v30 = vld [vmem:[%s1861_s0 + $0x58] sm:$0xff]  }
   0xb   :  { %1424 = vmatpush3.bf16.msra.mxu0 %v1517_v2  ;;  %1509 = vmatpush3.bf16.msra.mxu1 %v1517_v2  ;;  %v1544_v29 = vld [vmem:[%s1861_s0 + $0xd0] sm:$0xff]   ;;  %v1546_v31 = vld [vmem:[%s1861_s0 + $0xd8] sm:$0xff]   ;;  %v1547_v32 = vld [vmem:[%s1861_s0 + $0x60] sm:$0xff]  }
   0xc   :  { %1425 = vmatprep.subr.bf16.mxu0 %v1518_v3  ;;  %1502 = vmatprep.subr.bf16.mxu1 %v1518_v3  ;;  %v1548_v33 = vld [vmem:[%s1861_s0 + $0xe0] sm:$0xff]   ;;  %v1549_v34 = vld [vmem:[%s1861_s0 + $0x68] sm:$0xff]   ;;  %v1551_v36 = vld [vmem:[%s1861_s0 + $0x70] sm:$0xff]  }
   0xd   :  { %v1550_v35 = vld [vmem:[%s1861_s0 + $0xe8] sm:$0xff]   ;;  %v1552_v37 = vld [vmem:[%s1861_s0 + $0xf0] sm:$0xff]   ;;  %v1553_v38 = vld [vmem:[%s1861_s0 + $0x78] sm:$0xff]  }
   0xe   :  { %v1554_v39 = vld [vmem:[%s1861_s0 + $0xf8] sm:$0xff]   ;;  %v1698_v40 = vld [vmem:[%s1862_s2] ss:$0 sm:$0xff] }
   0xf   :  { %1426 = vmatpush3.bf16.msra.mxu0 %v1518_v3  ;;  %1510 = vmatpush3.bf16.msra.mxu1 %v1518_v3 }
  0x10   :  { %1427 = vmatprep.subr.bf16.mxu0 %v1519_v6  ;;  %1503 = vmatprep.subr.bf16.mxu1 %v1519_v6 }
  0x13   :  { %1428 = vmatpush3.bf16.msra.mxu0 %v1519_v6  ;;  %1511 = vmatpush3.bf16.msra.mxu1 %v1519_v6 }
  0x14   :  { %1429 = vmatprep.subr.bf16.mxu0 %v1520_v7  ;;  %1504 = vmatprep.subr.bf16.mxu1 %v1520_v7 }
  0x17   :  { %1430 = vmatpush3.bf16.msra.mxu0 %v1520_v7  ;;  %1512 = vmatpush3.bf16.msra.mxu1 %v1520_v7 }
  0x18   :  { %1431 = vmatprep.subr.bf16.mxu0 %v1521_v8  ;;  %1505 = vmatprep.subr.bf16.mxu1 %v1521_v8 }
  0x1b   :  { %1432 = vmatpush3.bf16.msra.mxu0 %v1521_v8  ;;  %1513 = vmatpush3.bf16.msra.mxu1 %v1521_v8 }
  0x1c   :  { %1433 = vmatprep.subr.bf16.mxu0 %v1522_v9  ;;  %1506 = vmatprep.subr.bf16.mxu1 %v1522_v9 }
  0x1f   :  { %1434 = vmatpush3.bf16.msra.mxu0 %v1522_v9  ;;  %1514 = vmatpush3.bf16.msra.mxu1 %v1522_v9 }
  0x22   :  { %1436 = vmatmul.mubr.bf16.vlgmr.msra.gmra.mxu0 %v1525_v10  ;;  %1468 = vmatmul.mubr.bf16.vlgmr.msra.gmra.mxu1 %v1526_v11 }
  0x23   :  { %1439 = vmatprep.mubr.bf16.mxu0 %v1527_v12  ;;  %1471 = vmatprep.mubr.bf16.mxu1 %v1528_v13 }
  0x2a   :  { %1440 = vmatmul.mubr.bf16.gmra.mxu0 %v1529_v14  ;;  %1472 = vmatmul.mubr.bf16.gmra.mxu1 %v1530_v15 }
  0x2b   :  { %1443 = vmatprep.mubr.bf16.mxu0 %v1531_v16  ;;  %1475 = vmatprep.mubr.bf16.mxu1 %v1532_v17 }
  0x32   :  { %1444 = vmatmul.mubr.bf16.gmra.mxu0 %v1533_v18  ;;  %1476 = vmatmul.mubr.bf16.gmra.mxu1 %v1534_v19 }
  0x33   :  { %1447 = vmatprep.mubr.bf16.mxu0 %v1535_v20  ;;  %1479 = vmatprep.mubr.bf16.mxu1 %v1536_v21 }
  0x3a   :  { %1448 = vmatmul.mubr.bf16.gmra.mxu0 %v1537_v22  ;;  %1480 = vmatmul.mubr.bf16.gmra.mxu1 %v1538_v23 }
  0x3b   :  { %1451 = vmatprep.mubr.bf16.mxu0 %v1539_v24  ;;  %1483 = vmatprep.mubr.bf16.mxu1 %v1540_v25 }
  0x42   :  { %1452 = vmatmul.mubr.bf16.gmra.mxu0 %v1541_v26  ;;  %1484 = vmatmul.mubr.bf16.gmra.mxu1 %v1542_v27 }
  0x43   :  { %1455 = vmatprep.mubr.bf16.mxu0 %v1543_v28  ;;  %1487 = vmatprep.mubr.bf16.mxu1 %v1544_v29 }
  0x4a   :  { %1456 = vmatmul.mubr.bf16.gmra.mxu0 %v1545_v30  ;;  %1488 = vmatmul.mubr.bf16.gmra.mxu1 %v1546_v31 }
  0x4b   :  { %1459 = vmatprep.mubr.bf16.mxu0 %v1547_v32  ;;  %1491 = vmatprep.mubr.bf16.mxu1 %v1548_v33 }
  0x52   :  { %1460 = vmatmul.mubr.bf16.gmra.mxu0 %v1549_v34  ;;  %1492 = vmatmul.mubr.bf16.gmra.mxu1 %v1550_v35 }
  0x53   :  { %1463 = vmatprep.mubr.bf16.mxu0 %v1551_v36  ;;  %1495 = vmatprep.mubr.bf16.mxu1 %v1552_v37 }
  0x5a   :  { %1464 = vmatmul.mubr.bf16.gmra.mxu0 %v1553_v38  ;;  %1496 = vmatmul.mubr.bf16.gmra.mxu1 %v1554_v39 }
  0xe2   :  { %v1437_v41 = vpop.f32.mrf.mxu0  ;;  %v1469_v42 = vpop.f32.mrf.mxu1 }
  0xe3   :  { %v385_v43 = vadd.f32 %v1437_v41, %v1698_v40  ;;  %v513_v44 = vadd.f32 %v1469_v42, %v1698_v40 }
  0xe4   :  { %v376_v45 = vpop.f32.mrf.mxu0  ;;  %v504_v46 = vpop.f32.mrf.mxu1 }
  0xe5   :  { %v377_v47 = vadd.f32 %v1698_v40, %v376_v45  ;;  %v505_v48 = vadd.f32 %v1698_v40, %v504_v46  ;;  %v633_v53 = vmax.f32 %v385_v43, 0.0  ;;  %v665_v54 = vmax.f32 %v513_v44, 0.0 }
  0xe6   :  { %v1438_v49 = vpop.f32.mrf.mxu0  ;;  %v1470_v50 = vpop.f32.mrf.mxu1 }
  0xe7   :  { %v388_v51 = vadd.f32 %v1438_v49, %v1698_v40  ;;  %v516_v52 = vadd.f32 %v1470_v50, %v1698_v40  ;;  %v631_v61 = vmax.f32 %v377_v47, 0.0  ;;  %v663_v62 = vmax.f32 %v505_v48, 0.0 }
  0xe8   :  { %v379_v55 = vpop.f32.mrf.mxu0  ;;  %v507_v56 = vpop.f32.mrf.mxu1 }
  0xe9   :  { %v634_v57 = vmax.f32 %v388_v51, 0.0  ;;  %v666_v58 = vmax.f32 %v516_v52, 0.0  ;;  %v380_v59 = vadd.f32 %v1698_v40, %v379_v55  ;;  %v508_v60 = vadd.f32 %v1698_v40, %v507_v56 }
  0xea   :  { %v1441_v63 = vpop.f32.mrf.mxu0  ;;  %v1473_v0 = vpop.f32.mrf.mxu1 }
  0xeb   :  { %v1196_v1 = vpack.c.bf16 %v634_v57, %v633_v53  ;;  %v1276_v2 = vpack.c.bf16 %v666_v58, %v665_v54  ;;  %v632_v3 = vmax.f32 %v380_v59, 0.0  ;;  %v664_v4 = vmax.f32 %v508_v60, 0.0 }
  0xec   :  { %v401_v5 = vadd.f32 %v1441_v63, %v1698_v40  ;;  %v529_v6 = vadd.f32 %v1473_v0, %v1698_v40  ;;  %v392_v7 = vpop.f32.mrf.mxu0  ;;  %v520_v8 = vpop.f32.mrf.mxu1 }
  0xed   :  { %1348 = vst [vmem:[%s1863_s3 + $0x8] sm:$0xff] %v1196_v1   ;;  %1364 = vst [vmem:[%s1863_s3 + $0x88] sm:$0xff] %v1276_v2   ;;  %v1191_v9 = vpack.c.bf16 %v632_v3, %v631_v61  ;;  %v1271_v10 = vpack.c.bf16 %v664_v4, %v663_v62  ;;  %v393_v11 = vadd.f32 %v1698_v40, %v392_v7 }
  0xee   :  { %v521_v12 = vadd.f32 %v1698_v40, %v520_v8  ;;  %v1442_v13 = vpop.f32.mrf.mxu0  ;;  %v1474_v14 = vpop.f32.mrf.mxu1  ;;  %v637_v17 = vmax.f32 %v401_v5, 0.0  ;;  %v669_v18 = vmax.f32 %v529_v6, 0.0 }
  0xef   :  { %1192 = vst [vmem:[%s1863_s3] sm:$0xff] %v1191_v9   ;;  %1363 = vst [vmem:[%s1863_s3 + $0x80] sm:$0xff] %v1271_v10   ;;  %v404_v15 = vadd.f32 %v1442_v13, %v1698_v40  ;;  %v532_v16 = vadd.f32 %v1474_v14, %v1698_v40  ;;  %v635_v25 = vmax.f32 %v393_v11, 0.0 }
  0xf0   :  { %v395_v19 = vpop.f32.mrf.mxu0  ;;  %v523_v20 = vpop.f32.mrf.mxu1  ;;  %v667_v26 = vmax.f32 %v521_v12, 0.0 }
  0xf1   :  { %v638_v21 = vmax.f32 %v404_v15, 0.0  ;;  %v670_v22 = vmax.f32 %v532_v16, 0.0  ;;  %v396_v23 = vadd.f32 %v1698_v40, %v395_v19  ;;  %v524_v24 = vadd.f32 %v1698_v40, %v523_v20 }
  0xf2   :  { %v1445_v27 = vpop.f32.mrf.mxu0  ;;  %v1477_v28 = vpop.f32.mrf.mxu1 }
  0xf3   :  { %v1206_v29 = vpack.c.bf16 %v638_v21, %v637_v17  ;;  %v1286_v30 = vpack.c.bf16 %v670_v22, %v669_v18  ;;  %v636_v31 = vmax.f32 %v396_v23, 0.0  ;;  %v668_v32 = vmax.f32 %v524_v24, 0.0 }
  0xf4   :  { %v417_v33 = vadd.f32 %v1445_v27, %v1698_v40  ;;  %v545_v34 = vadd.f32 %v1477_v28, %v1698_v40  ;;  %v408_v35 = vpop.f32.mrf.mxu0  ;;  %v536_v36 = vpop.f32.mrf.mxu1 }
  0xf5   :  { %1350 = vst [vmem:[%s1863_s3 + $0x18] sm:$0xff] %v1206_v29   ;;  %1366 = vst [vmem:[%s1863_s3 + $0x98] sm:$0xff] %v1286_v30   ;;  %v1201_v37 = vpack.c.bf16 %v636_v31, %v635_v25  ;;  %v1281_v38 = vpack.c.bf16 %v668_v32, %v667_v26  ;;  %v409_v39 = vadd.f32 %v1698_v40, %v408_v35 }
  0xf6   :  { %v537_v41 = vadd.f32 %v1698_v40, %v536_v36  ;;  %v1446_v42 = vpop.f32.mrf.mxu0  ;;  %v1478_v43 = vpop.f32.mrf.mxu1  ;;  %v641_v46 = vmax.f32 %v417_v33, 0.0  ;;  %v673_v47 = vmax.f32 %v545_v34, 0.0 }
  0xf7   :  { %1349 = vst [vmem:[%s1863_s3 + $0x10] sm:$0xff] %v1201_v37   ;;  %1365 = vst [vmem:[%s1863_s3 + $0x90] sm:$0xff] %v1281_v38   ;;  %v420_v44 = vadd.f32 %v1446_v42, %v1698_v40  ;;  %v548_v45 = vadd.f32 %v1478_v43, %v1698_v40  ;;  %v639_v54 = vmax.f32 %v409_v39, 0.0 }
  0xf8   :  { %v411_v48 = vpop.f32.mrf.mxu0  ;;  %v539_v49 = vpop.f32.mrf.mxu1  ;;  %v671_v55 = vmax.f32 %v537_v41, 0.0 }
  0xf9   :  { %v642_v50 = vmax.f32 %v420_v44, 0.0  ;;  %v674_v51 = vmax.f32 %v548_v45, 0.0  ;;  %v412_v52 = vadd.f32 %v1698_v40, %v411_v48  ;;  %v540_v53 = vadd.f32 %v1698_v40, %v539_v49 }
  0xfa   :  { %v1449_v56 = vpop.f32.mrf.mxu0  ;;  %v1481_v57 = vpop.f32.mrf.mxu1 }
  0xfb   :  { %v1216_v58 = vpack.c.bf16 %v642_v50, %v641_v46  ;;  %v1296_v59 = vpack.c.bf16 %v674_v51, %v673_v47  ;;  %v640_v60 = vmax.f32 %v412_v52, 0.0  ;;  %v672_v61 = vmax.f32 %v540_v53, 0.0 }
  0xfc   :  { %v433_v62 = vadd.f32 %v1449_v56, %v1698_v40  ;;  %v561_v63 = vadd.f32 %v1481_v57, %v1698_v40  ;;  %v424_v0 = vpop.f32.mrf.mxu0  ;;  %v552_v1 = vpop.f32.mrf.mxu1 }
  0xfd   :  { %1352 = vst [vmem:[%s1863_s3 + $0x28] sm:$0xff] %v1216_v58   ;;  %1368 = vst [vmem:[%s1863_s3 + $0xa8] sm:$0xff] %v1296_v59   ;;  %v1211_v2 = vpack.c.bf16 %v640_v60, %v639_v54  ;;  %v1291_v3 = vpack.c.bf16 %v672_v61, %v671_v55  ;;  %v425_v4 = vadd.f32 %v1698_v40, %v424_v0 }
  0xfe   :  { %v553_v5 = vadd.f32 %v1698_v40, %v552_v1  ;;  %v1450_v6 = vpop.f32.mrf.mxu0  ;;  %v1482_v7 = vpop.f32.mrf.mxu1  ;;  %v645_v10 = vmax.f32 %v433_v62, 0.0  ;;  %v677_v11 = vmax.f32 %v561_v63, 0.0 }
  0xff   :  { %1351 = vst [vmem:[%s1863_s3 + $0x20] sm:$0xff] %v1211_v2   ;;  %1367 = vst [vmem:[%s1863_s3 + $0xa0] sm:$0xff] %v1291_v3   ;;  %v436_v8 = vadd.f32 %v1450_v6, %v1698_v40  ;;  %v564_v9 = vadd.f32 %v1482_v7, %v1698_v40  ;;  %v643_v18 = vmax.f32 %v425_v4, 0.0 }
 0x100   :  { %v427_v12 = vpop.f32.mrf.mxu0  ;;  %v555_v13 = vpop.f32.mrf.mxu1  ;;  %v675_v19 = vmax.f32 %v553_v5, 0.0 }
 0x101   :  { %v646_v14 = vmax.f32 %v436_v8, 0.0  ;;  %v678_v15 = vmax.f32 %v564_v9, 0.0  ;;  %v428_v16 = vadd.f32 %v1698_v40, %v427_v12  ;;  %v556_v17 = vadd.f32 %v1698_v40, %v555_v13 }
 0x102   :  { %v1453_v20 = vpop.f32.mrf.mxu0  ;;  %v1485_v21 = vpop.f32.mrf.mxu1 }
 0x103   :  { %v1226_v22 = vpack.c.bf16 %v646_v14, %v645_v10  ;;  %v1306_v23 = vpack.c.bf16 %v678_v15, %v677_v11  ;;  %v644_v24 = vmax.f32 %v428_v16, 0.0  ;;  %v676_v25 = vmax.f32 %v556_v17, 0.0 }
 0x104   :  { %v449_v26 = vadd.f32 %v1453_v20, %v1698_v40  ;;  %v577_v27 = vadd.f32 %v1485_v21, %v1698_v40  ;;  %v440_v28 = vpop.f32.mrf.mxu0  ;;  %v568_v29 = vpop.f32.mrf.mxu1 }
 0x105   :  { %1354 = vst [vmem:[%s1863_s3 + $0x38] sm:$0xff] %v1226_v22   ;;  %1370 = vst [vmem:[%s1863_s3 + $0xb8] sm:$0xff] %v1306_v23   ;;  %v1221_v30 = vpack.c.bf16 %v644_v24, %v643_v18  ;;  %v1301_v31 = vpack.c.bf16 %v676_v25, %v675_v19  ;;  %v441_v32 = vadd.f32 %v1698_v40, %v440_v28 }
 0x106   :  { %v569_v33 = vadd.f32 %v1698_v40, %v568_v29  ;;  %v1454_v34 = vpop.f32.mrf.mxu0  ;;  %v1486_v35 = vpop.f32.mrf.mxu1  ;;  %v649_v38 = vmax.f32 %v449_v26, 0.0  ;;  %v681_v39 = vmax.f32 %v577_v27, 0.0 }
 0x107   :  { %1353 = vst [vmem:[%s1863_s3 + $0x30] sm:$0xff] %v1221_v30   ;;  %1369 = vst [vmem:[%s1863_s3 + $0xb0] sm:$0xff] %v1301_v31   ;;  %v452_v36 = vadd.f32 %v1454_v34, %v1698_v40  ;;  %v580_v37 = vadd.f32 %v1486_v35, %v1698_v40  ;;  %v647_v47 = vmax.f32 %v441_v32, 0.0 }
 0x108   :  { %v443_v41 = vpop.f32.mrf.mxu0  ;;  %v571_v42 = vpop.f32.mrf.mxu1  ;;  %v679_v48 = vmax.f32 %v569_v33, 0.0 }
 0x109   :  { %v650_v43 = vmax.f32 %v452_v36, 0.0  ;;  %v682_v44 = vmax.f32 %v580_v37, 0.0  ;;  %v444_v45 = vadd.f32 %v1698_v40, %v443_v41  ;;  %v572_v46 = vadd.f32 %v1698_v40, %v571_v42 }
 0x10a   :  { %v1457_v49 = vpop.f32.mrf.mxu0  ;;  %v1489_v50 = vpop.f32.mrf.mxu1 }
 0x10b   :  { %v1236_v51 = vpack.c.bf16 %v650_v43, %v649_v38  ;;  %v1316_v52 = vpack.c.bf16 %v682_v44, %v681_v39  ;;  %v648_v53 = vmax.f32 %v444_v45, 0.0  ;;  %v680_v54 = vmax.f32 %v572_v46, 0.0 }
 0x10c   :  { %v465_v55 = vadd.f32 %v1457_v49, %v1698_v40  ;;  %v593_v56 = vadd.f32 %v1489_v50, %v1698_v40  ;;  %v456_v57 = vpop.f32.mrf.mxu0  ;;  %v584_v58 = vpop.f32.mrf.mxu1 }
 0x10d   :  { %1356 = vst [vmem:[%s1863_s3 + $0x48] sm:$0xff] %v1236_v51   ;;  %1372 = vst [vmem:[%s1863_s3 + $0xc8] sm:$0xff] %v1316_v52   ;;  %v1231_v59 = vpack.c.bf16 %v648_v53, %v647_v47  ;;  %v1311_v60 = vpack.c.bf16 %v680_v54, %v679_v48  ;;  %v457_v61 = vadd.f32 %v1698_v40, %v456_v57 }
 0x10e   :  { %v585_v62 = vadd.f32 %v1698_v40, %v584_v58  ;;  %v1458_v63 = vpop.f32.mrf.mxu0  ;;  %v1490_v0 = vpop.f32.mrf.mxu1  ;;  %v653_v3 = vmax.f32 %v465_v55, 0.0  ;;  %v685_v4 = vmax.f32 %v593_v56, 0.0 }
 0x10f   :  { %1355 = vst [vmem:[%s1863_s3 + $0x40] sm:$0xff] %v1231_v59   ;;  %1371 = vst [vmem:[%s1863_s3 + $0xc0] sm:$0xff] %v1311_v60   ;;  %v468_v1 = vadd.f32 %v1458_v63, %v1698_v40  ;;  %v596_v2 = vadd.f32 %v1490_v0, %v1698_v40  ;;  %v651_v11 = vmax.f32 %v457_v61, 0.0 }
 0x110   :  { %v459_v5 = vpop.f32.mrf.mxu0  ;;  %v587_v6 = vpop.f32.mrf.mxu1  ;;  %v683_v12 = vmax.f32 %v585_v62, 0.0 }
 0x111   :  { %v654_v7 = vmax.f32 %v468_v1, 0.0  ;;  %v686_v8 = vmax.f32 %v596_v2, 0.0  ;;  %v460_v9 = vadd.f32 %v1698_v40, %v459_v5  ;;  %v588_v10 = vadd.f32 %v1698_v40, %v587_v6 }
 0x112   :  { %v1461_v13 = vpop.f32.mrf.mxu0  ;;  %v1493_v14 = vpop.f32.mrf.mxu1 }
 0x113   :  { %v1246_v15 = vpack.c.bf16 %v654_v7, %v653_v3  ;;  %v1326_v16 = vpack.c.bf16 %v686_v8, %v685_v4  ;;  %v652_v17 = vmax.f32 %v460_v9, 0.0  ;;  %v684_v18 = vmax.f32 %v588_v10, 0.0 }
 0x114   :  { %v481_v19 = vadd.f32 %v1461_v13, %v1698_v40  ;;  %v609_v20 = vadd.f32 %v1493_v14, %v1698_v40  ;;  %v472_v21 = vpop.f32.mrf.mxu0  ;;  %v600_v22 = vpop.f32.mrf.mxu1 }
 0x115   :  { %1358 = vst [vmem:[%s1863_s3 + $0x58] sm:$0xff] %v1246_v15   ;;  %1374 = vst [vmem:[%s1863_s3 + $0xd8] sm:$0xff] %v1326_v16   ;;  %v1241_v23 = vpack.c.bf16 %v652_v17, %v651_v11  ;;  %v1321_v24 = vpack.c.bf16 %v684_v18, %v683_v12  ;;  %v473_v25 = vadd.f32 %v1698_v40, %v472_v21 }
 0x116   :  { %v601_v26 = vadd.f32 %v1698_v40, %v600_v22  ;;  %v1462_v27 = vpop.f32.mrf.mxu0  ;;  %v1494_v28 = vpop.f32.mrf.mxu1  ;;  %v657_v31 = vmax.f32 %v481_v19, 0.0  ;;  %v689_v32 = vmax.f32 %v609_v20, 0.0 }
 0x117   :  { %1357 = vst [vmem:[%s1863_s3 + $0x50] sm:$0xff] %v1241_v23   ;;  %1373 = vst [vmem:[%s1863_s3 + $0xd0] sm:$0xff] %v1321_v24   ;;  %v484_v29 = vadd.f32 %v1462_v27, %v1698_v40  ;;  %v612_v30 = vadd.f32 %v1494_v28, %v1698_v40  ;;  %v655_v39 = vmax.f32 %v473_v25, 0.0 }
 0x118   :  { %v475_v33 = vpop.f32.mrf.mxu0  ;;  %v603_v34 = vpop.f32.mrf.mxu1  ;;  %v687_v41 = vmax.f32 %v601_v26, 0.0 }
 0x119   :  { %v658_v35 = vmax.f32 %v484_v29, 0.0  ;;  %v690_v36 = vmax.f32 %v612_v30, 0.0  ;;  %v476_v37 = vadd.f32 %v1698_v40, %v475_v33  ;;  %v604_v38 = vadd.f32 %v1698_v40, %v603_v34 }
 0x11a   :  { %v1465_v42 = vpop.f32.mrf.mxu0  ;;  %v1497_v43 = vpop.f32.mrf.mxu1 }
 0x11b   :  { %v1256_v44 = vpack.c.bf16 %v658_v35, %v657_v31  ;;  %v1336_v45 = vpack.c.bf16 %v690_v36, %v689_v32  ;;  %v656_v46 = vmax.f32 %v476_v37, 0.0  ;;  %v688_v47 = vmax.f32 %v604_v38, 0.0 }
 0x11c   :  { %v497_v48 = vadd.f32 %v1465_v42, %v1698_v40  ;;  %v625_v49 = vadd.f32 %v1497_v43, %v1698_v40  ;;  %v488_v50 = vpop.f32.mrf.mxu0  ;;  %v616_v51 = vpop.f32.mrf.mxu1 }
 0x11d   :  { %1360 = vst [vmem:[%s1863_s3 + $0x68] sm:$0xff] %v1256_v44   ;;  %1376 = vst [vmem:[%s1863_s3 + $0xe8] sm:$0xff] %v1336_v45   ;;  %v1251_v52 = vpack.c.bf16 %v656_v46, %v655_v39  ;;  %v1331_v53 = vpack.c.bf16 %v688_v47, %v687_v41  ;;  %v489_v54 = vadd.f32 %v1698_v40, %v488_v50 }
 0x11e   :  { %v617_v55 = vadd.f32 %v1698_v40, %v616_v51  ;;  %v1466_v56 = vpop.f32.mrf.mxu0  ;;  %v1498_v57 = vpop.f32.mrf.mxu1  ;;  %v661_v60 = vmax.f32 %v497_v48, 0.0  ;;  %v693_v61 = vmax.f32 %v625_v49, 0.0 }
 0x11f   :  { %1359 = vst [vmem:[%s1863_s3 + $0x60] sm:$0xff] %v1251_v52   ;;  %1375 = vst [vmem:[%s1863_s3 + $0xe0] sm:$0xff] %v1331_v53   ;;  %v500_v58 = vadd.f32 %v1466_v56, %v1698_v40  ;;  %v628_v59 = vadd.f32 %v1498_v57, %v1698_v40  ;;  %v659_v4 = vmax.f32 %v489_v54, 0.0 }
 0x120   :  { %v491_v62 = vpop.f32.mrf.mxu0  ;;  %v619_v63 = vpop.f32.mrf.mxu1  ;;  %v691_v5 = vmax.f32 %v617_v55, 0.0 }
 0x121   :  { %v662_v0 = vmax.f32 %v500_v58, 0.0  ;;  %v694_v1 = vmax.f32 %v628_v59, 0.0  ;;  %v492_v2 = vadd.f32 %v1698_v40, %v491_v62  ;;  %v620_v3 = vadd.f32 %v1698_v40, %v619_v63 }
 0x123   :  { %v1266_v6 = vpack.c.bf16 %v662_v0, %v661_v60  ;;  %v1346_v7 = vpack.c.bf16 %v694_v1, %v693_v61  ;;  %v660_v8 = vmax.f32 %v492_v2, 0.0  ;;  %v692_v9 = vmax.f32 %v620_v3, 0.0 }
 0x125   :  { %1362 = vst [vmem:[%s1863_s3 + $0x78] sm:$0xff] %v1266_v6   ;;  %1378 = vst [vmem:[%s1863_s3 + $0xf8] sm:$0xff] %v1346_v7   ;;  %v1261_v10 = vpack.c.bf16 %v660_v8, %v659_v4  ;;  %v1341_v11 = vpack.c.bf16 %v692_v9, %v691_v5 }
 0x127   :  { %1361 = vst [vmem:[%s1863_s3 + $0x70] sm:$0xff] %v1261_v10   ;;  %1377 = vst [vmem:[%s1863_s3 + $0xf0] sm:$0xff] %v1341_v11  }

// kernel: rsfnet_forward.6
= control target key start
LH: loop header
LB: loop body
LE: loop exit
PB: predicated region body
PF: predicated region fallthrough
CT: control target
= control target key end

     0   :  { %s836_s1 = inlined_call_operand.vmem [shape: bf16[256,128], index: 1, kind: input, shape index: {}]   ;;  %s837_s0 = inlined_call_operand.vmem [shape: bf16[128,256], index: 0, kind: input, shape index: {}]   ;;  %s838_s2 = inlined_call_operand.vmem [shape: f32[1,128], index: 2, kind: input, shape index: {}]   ;;  %s839_s3 = inlined_call_operand.vmem [shape: bf16[128,128], index: 3, kind: output, shape index: {}]  }
   0x1   :  { %v635_v0 = vld [vmem:[%s836_s1 + $0x78] sm:$0xff]   ;;  %v637_v2 = vld [vmem:[%s836_s1 + $0x70] sm:$0xff]   ;;  %v639_v4 = vld [vmem:[%s836_s1 + $0x68] sm:$0xff]  }
   0x2   :  { %v636_v1 = vld [vmem:[%s836_s1 + $0x38] sm:$0xff]   ;;  %555 = vmatprep.subr.bf16.mxu0 %v635_v0  ;;  %619 = vmatprep.subr.bf16.mxu1 %v635_v0  ;;  %v638_v3 = vld [vmem:[%s836_s1 + $0x30] sm:$0xff]   ;;  %v640_v5 = vld [vmem:[%s836_s1 + $0x28] sm:$0xff]  }
   0x3   :  { %556 = vmatpush3.bf16.msra.mxu0 %v636_v1  ;;  %627 = vmatpush3.bf16.msra.mxu1 %v636_v1  ;;  %v641_v6 = vld [vmem:[%s836_s1 + $0x60] sm:$0xff]   ;;  %v643_v8 = vld [vmem:[%s836_s1 + $0x58] sm:$0xff]   ;;  %v645_v10 = vld [vmem:[%s836_s1 + $0x50] sm:$0xff]  }
   0x4   :  { %557 = vmatprep.subr.bf16.mxu0 %v637_v2  ;;  %620 = vmatprep.subr.bf16.mxu1 %v637_v2  ;;  %v642_v7 = vld [vmem:[%s836_s1 + $0x20] sm:$0xff]   ;;  %v644_v9 = vld [vmem:[%s836_s1 + $0x18] sm:$0xff]   ;;  %v646_v13 = vld [vmem:[%s836_s1 + $0x10] sm:$0xff]  }
   0x5   :  { %v653_v11 = vld [vmem:[%s837_s0 + $0x4] ss:$8 sps:$4 sm:$0xff]   ;;  %v651_v18 = vld [vmem:[%s837_s0] ss:$8 sps:$4 sm:$0xff]   ;;  %v657_v20 = vld [vmem:[%s837_s0 + $0x14] ss:$8 sps:$4 sm:$0xff]  }
   0x6   :  { %v656_v12 = vld [vmem:[%s837_s0 + $0x44] ss:$8 sps:$4 sm:$0xff]   ;;  %278 = vmatprep.mubr.bf16.mxu0 %v653_v11  ;;  %v654_v19 = vld [vmem:[%s837_s0 + $0x40] ss:$8 sps:$4 sm:$0xff]   ;;  %v659_v21 = vld [vmem:[%s837_s0 + $0x54] ss:$8 sps:$4 sm:$0xff]  }
   0x7   :  { %558 = vmatpush3.bf16.msra.mxu0 %v638_v3  ;;  %628 = vmatpush3.bf16.msra.mxu1 %v638_v3  ;;  %v647_v14 = vld [vmem:[%s836_s1 + $0x48] sm:$0xff]   ;;  %v649_v16 = vld [vmem:[%s836_s1 + $0x40] sm:$0xff]   ;;  %v661_v22 = vld [vmem:[%s837_s0 + $0x10] ss:$8 sps:$4 sm:$0xff]  }
   0x8   :  { %559 = vmatprep.subr.bf16.mxu0 %v639_v4  ;;  %621 = vmatprep.subr.bf16.mxu1 %v639_v4  ;;  %v648_v15 = vld [vmem:[%s836_s1 + $0x8] sm:$0xff]   ;;  %v650_v17 = vld [vmem:[%s836_s1] sm:$0xff]   ;;  %v662_v23 = vld [vmem:[%s837_s0 + $0x50] ss:$8 sps:$4 sm:$0xff]  }
   0x9   :  { %310 = vmatprep.mubr.bf16.mxu1 %v656_v12  ;;  %v663_v24 = vld [vmem:[%s837_s0 + $0x24] ss:$8 sps:$4 sm:$0xff]   ;;  %v667_v26 = vld [vmem:[%s837_s0 + $0x20] ss:$8 sps:$4 sm:$0xff]   ;;  %v669_v28 = vld [vmem:[%s837_s0 + $0x34] ss:$8 sps:$4 sm:$0xff]  }
   0xa   :  { %v665_v25 = vld [vmem:[%s837_s0 + $0x64] ss:$8 sps:$4 sm:$0xff]   ;;  %v668_v27 = vld [vmem:[%s837_s0 + $0x60] ss:$8 sps:$4 sm:$0xff]   ;;  %v671_v29 = vld [vmem:[%s837_s0 + $0x74] ss:$8 sps:$4 sm:$0xff]  }
   0xb   :  { %560 = vmatpush3.bf16.msra.mxu0 %v640_v5  ;;  %629 = vmatpush3.bf16.msra.mxu1 %v640_v5  ;;  %v673_v30 = vld [vmem:[%s837_s0 + $0x30] ss:$8 sps:$4 sm:$0xff]   ;;  %v794_v36 = vld [vmem:[%s838_s2] ss:$0 sm:$0xff] }
   0xc   :  { %561 = vmatprep.subr.bf16.mxu0 %v641_v6  ;;  %622 = vmatprep.subr.bf16.mxu1 %v641_v6  ;;  %v674_v31 = vld [vmem:[%s837_s0 + $0x70] ss:$8 sps:$4 sm:$0xff]  }
   0xf   :  { %562 = vmatpush3.bf16.msra.mxu0 %v642_v7  ;;  %630 = vmatpush3.bf16.msra.mxu1 %v642_v7 }
  0x10   :  { %563 = vmatprep.subr.bf16.mxu0 %v643_v8  ;;  %623 = vmatprep.subr.bf16.mxu1 %v643_v8 }
  0x13   :  { %564 = vmatpush3.bf16.msra.mxu0 %v644_v9  ;;  %631 = vmatpush3.bf16.msra.mxu1 %v644_v9 }
  0x14   :  { %565 = vmatprep.subr.bf16.mxu0 %v645_v10  ;;  %624 = vmatprep.subr.bf16.mxu1 %v645_v10 }
  0x17   :  { %566 = vmatpush3.bf16.msra.mxu0 %v646_v13  ;;  %632 = vmatpush3.bf16.msra.mxu1 %v646_v13 }
  0x18   :  { %567 = vmatprep.subr.bf16.mxu0 %v647_v14  ;;  %625 = vmatprep.subr.bf16.mxu1 %v647_v14 }
  0x1b   :  { %568 = vmatpush3.bf16.msra.mxu0 %v648_v15  ;;  %633 = vmatpush3.bf16.msra.mxu1 %v648_v15 }
  0x1c   :  { %569 = vmatprep.subr.bf16.mxu0 %v649_v16  ;;  %626 = vmatprep.subr.bf16.mxu1 %v649_v16 }
  0x1f   :  { %570 = vmatpush3.bf16.msra.mxu0 %v650_v17  ;;  %634 = vmatpush3.bf16.msra.mxu1 %v650_v17 }
  0x22   :  { %279 = vmatmul.mubr.bf16.vlgmr.msra.gmra.mxu0 %v651_v18  ;;  %311 = vmatmul.mubr.bf16.vlgmr.msra.gmra.mxu1 %v654_v19 }
  0x23   :  { %286 = vmatprep.mubr.bf16.mxu0 %v657_v20  ;;  %318 = vmatprep.mubr.bf16.mxu1 %v659_v21 }
  0x2a   :  { %287 = vmatmul.mubr.bf16.gmra.mxu0 %v661_v22  ;;  %319 = vmatmul.mubr.bf16.gmra.mxu1 %v662_v23 }
  0x2b   :  { %294 = vmatprep.mubr.bf16.mxu0 %v663_v24  ;;  %326 = vmatprep.mubr.bf16.mxu1 %v665_v25 }
  0x32   :  { %295 = vmatmul.mubr.bf16.gmra.mxu0 %v667_v26  ;;  %327 = vmatmul.mubr.bf16.gmra.mxu1 %v668_v27 }
  0x33   :  { %302 = vmatprep.mubr.bf16.mxu0 %v669_v28  ;;  %334 = vmatprep.mubr.bf16.mxu1 %v671_v29 }
  0x3a   :  { %303 = vmatmul.mubr.bf16.gmra.mxu0 %v673_v30  ;;  %335 = vmatmul.mubr.bf16.gmra.mxu1 %v674_v31 }
  0xe2   :  { %v571_v32 = vpop.f32.mrf.mxu0  ;;  %v595_v33 = vpop.f32.mrf.mxu1 }
  0xe4   :  { %v572_v34 = vpop.f32.mrf.mxu0  ;;  %v596_v35 = vpop.f32.mrf.mxu1 }
  0xe5   :  { %v573_v37 = vadd.f32 %v572_v34, %v571_v32  ;;  %v597_v38 = vadd.f32 %v596_v35, %v595_v33 }
  0xe6   :  { %v574_v39 = vpop.f32.mrf.mxu0  ;;  %v598_v40 = vpop.f32.mrf.mxu1 }
  0xe7   :  { %v281_v41 = vadd.f32 %v573_v37, %v794_v36  ;;  %v313_v42 = vadd.f32 %v597_v38, %v794_v36 }
  0xe8   :  { %v575_v43 = vpop.f32.mrf.mxu0  ;;  %v599_v44 = vpop.f32.mrf.mxu1 }
  0xe9   :  { %v576_v45 = vadd.f32 %v575_v43, %v574_v39  ;;  %v600_v46 = vadd.f32 %v599_v44, %v598_v40  ;;  %v343_v51 = vmax.f32 %v281_v41, 0.0  ;;  %v351_v52 = vmax.f32 %v313_v42, 0.0 }
  0xea   :  { %v577_v47 = vpop.f32.mrf.mxu0  ;;  %v601_v48 = vpop.f32.mrf.mxu1 }
  0xeb   :  { %v284_v49 = vadd.f32 %v576_v45, %v794_v36  ;;  %v316_v50 = vadd.f32 %v600_v46, %v794_v36 }
  0xec   :  { %v578_v53 = vpop.f32.mrf.mxu0  ;;  %v602_v54 = vpop.f32.mrf.mxu1 }
  0xed   :  { %v344_v55 = vmax.f32 %v284_v49, 0.0  ;;  %v352_v56 = vmax.f32 %v316_v50, 0.0  ;;  %v579_v57 = vadd.f32 %v578_v53, %v577_v47  ;;  %v603_v58 = vadd.f32 %v602_v54, %v601_v48 }
  0xee   :  { %v580_v59 = vpop.f32.mrf.mxu0  ;;  %v604_v60 = vpop.f32.mrf.mxu1 }
  0xef   :  { %v511_v61 = vpack.c.bf16 %v344_v55, %v343_v51  ;;  %v531_v62 = vpack.c.bf16 %v352_v56, %v351_v52  ;;  %v289_v63 = vadd.f32 %v579_v57, %v794_v36  ;;  %v321_v0 = vadd.f32 %v603_v58, %v794_v36 }
  0xf0   :  { %v581_v1 = vpop.f32.mrf.mxu0  ;;  %v605_v2 = vpop.f32.mrf.mxu1 }
  0xf1   :  { %512 = vst [vmem:[%s839_s3] sm:$0xff] %v511_v61   ;;  %551 = vst [vmem:[%s839_s3 + $0x20] sm:$0xff] %v531_v62   ;;  %v582_v3 = vadd.f32 %v581_v1, %v580_v59  ;;  %v606_v4 = vadd.f32 %v605_v2, %v604_v60  ;;  %v345_v9 = vmax.f32 %v289_v63, 0.0  ;;  %v353_v10 = vmax.f32 %v321_v0, 0.0 }
  0xf2   :  { %v583_v5 = vpop.f32.mrf.mxu0  ;;  %v607_v6 = vpop.f32.mrf.mxu1 }
  0xf3   :  { %v292_v7 = vadd.f32 %v582_v3, %v794_v36  ;;  %v324_v8 = vadd.f32 %v606_v4, %v794_v36 }
  0xf4   :  { %v584_v11 = vpop.f32.mrf.mxu0  ;;  %v608_v12 = vpop.f32.mrf.mxu1 }
  0xf5   :  { %v346_v13 = vmax.f32 %v292_v7, 0.0  ;;  %v354_v14 = vmax.f32 %v324_v8, 0.0  ;;  %v585_v15 = vadd.f32 %v584_v11, %v583_v5  ;;  %v609_v16 = vadd.f32 %v608_v12, %v607_v6 }
  0xf6   :  { %v586_v17 = vpop.f32.mrf.mxu0  ;;  %v610_v18 = vpop.f32.mrf.mxu1 }
  0xf7   :  { %v516_v19 = vpack.c.bf16 %v346_v13, %v345_v9  ;;  %v536_v20 = vpack.c.bf16 %v354_v14, %v353_v10  ;;  %v297_v21 = vadd.f32 %v585_v15, %v794_v36  ;;  %v329_v22 = vadd.f32 %v609_v16, %v794_v36 }
  0xf8   :  { %v587_v23 = vpop.f32.mrf.mxu0  ;;  %v611_v24 = vpop.f32.mrf.mxu1 }
  0xf9   :  { %548 = vst [vmem:[%s839_s3 + $0x8] sm:$0xff] %v516_v19   ;;  %552 = vst [vmem:[%s839_s3 + $0x28] sm:$0xff] %v536_v20   ;;  %v588_v25 = vadd.f32 %v587_v23, %v586_v17  ;;  %v612_v26 = vadd.f32 %v611_v24, %v610_v18  ;;  %v347_v31 = vmax.f32 %v297_v21, 0.0  ;;  %v355_v32 = vmax.f32 %v329_v22, 0.0 }
  0xfa   :  { %v589_v27 = vpop.f32.mrf.mxu0  ;;  %v613_v28 = vpop.f32.mrf.mxu1 }
  0xfb   :  { %v300_v29 = vadd.f32 %v588_v25, %v794_v36  ;;  %v332_v30 = vadd.f32 %v612_v26, %v794_v36 }
  0xfc   :  { %v590_v33 = vpop.f32.mrf.mxu0  ;;  %v614_v34 = vpop.f32.mrf.mxu1 }
  0xfd   :  { %v348_v35 = vmax.f32 %v300_v29, 0.0  ;;  %v356_v37 = vmax.f32 %v332_v30, 0.0  ;;  %v591_v38 = vadd.f32 %v590_v33, %v589_v27  ;;  %v615_v39 = vadd.f32 %v614_v34, %v613_v28 }
  0xfe   :  { %v592_v40 = vpop.f32.mrf.mxu0  ;;  %v616_v41 = vpop.f32.mrf.mxu1 }
  0xff   :  { %v521_v42 = vpack.c.bf16 %v348_v35, %v347_v31  ;;  %v541_v43 = vpack.c.bf16 %v356_v37, %v355_v32  ;;  %v305_v46 = vadd.f32 %v591_v38, %v794_v36  ;;  %v337_v47 = vadd.f32 %v615_v39, %v794_v36 }
 0x100   :  { %v593_v44 = vpop.f32.mrf.mxu0  ;;  %v617_v45 = vpop.f32.mrf.mxu1 }
 0x101   :  { %549 = vst [vmem:[%s839_s3 + $0x10] sm:$0xff] %v521_v42   ;;  %553 = vst [vmem:[%s839_s3 + $0x30] sm:$0xff] %v541_v43   ;;  %v594_v48 = vadd.f32 %v593_v44, %v592_v40  ;;  %v618_v49 = vadd.f32 %v617_v45, %v616_v41  ;;  %v349_v52 = vmax.f32 %v305_v46, 0.0  ;;  %v357_v53 = vmax.f32 %v337_v47, 0.0 }
 0x103   :  { %v308_v50 = vadd.f32 %v594_v48, %v794_v36  ;;  %v340_v51 = vadd.f32 %v618_v49, %v794_v36 }
 0x105   :  { %v350_v54 = vmax.f32 %v308_v50, 0.0  ;;  %v358_v55 = vmax.f32 %v340_v51, 0.0 }
 0x107   :  { %v526_v56 = vpack.c.bf16 %v350_v54, %v349_v52  ;;  %v546_v57 = vpack.c.bf16 %v358_v55, %v357_v53 }
 0x109   :  { %550 = vst [vmem:[%s839_s3 + $0x18] sm:$0xff] %v526_v56   ;;  %554 = vst [vmem:[%s839_s3 + $0x38] sm:$0xff] %v546_v57  }

// kernel: rsfnet_forward.7
= control target key start
LH: loop header
LB: loop body
LE: loop exit
PB: predicated region body
PF: predicated region fallthrough
CT: control target
= control target key end

     0   :  { %s877_s1 = inlined_call_operand.vmem [shape: bf16[256,128], index: 1, kind: input, shape index: {}]   ;;  %s878_s0 = inlined_call_operand.vmem [shape: bf16[128,256], index: 0, kind: input, shape index: {}]   ;;  %s879_s2 = inlined_call_operand.vmem [shape: f32[1,128], index: 2, kind: input, shape index: {}]   ;;  %s880_s3 = inlined_call_operand.vmem [shape: f32[128,128], index: 3, kind: output, shape index: {}]  }
   0x1   :  { %v588_v0 = vld [vmem:[%s877_s1 + $0x78] sm:$0xff]   ;;  %v590_v2 = vld [vmem:[%s877_s1 + $0x70] sm:$0xff]   ;;  %v592_v4 = vld [vmem:[%s877_s1 + $0x68] sm:$0xff]  }
   0x2   :  { %v589_v1 = vld [vmem:[%s877_s1 + $0x38] sm:$0xff]   ;;  %508 = vmatprep.subr.bf16.mxu0 %v588_v0  ;;  %572 = vmatprep.subr.bf16.mxu1 %v588_v0  ;;  %v591_v3 = vld [vmem:[%s877_s1 + $0x30] sm:$0xff]   ;;  %v593_v5 = vld [vmem:[%s877_s1 + $0x28] sm:$0xff]  }
   0x3   :  { %509 = vmatpush3.bf16.msra.mxu0 %v589_v1  ;;  %580 = vmatpush3.bf16.msra.mxu1 %v589_v1  ;;  %v594_v6 = vld [vmem:[%s877_s1 + $0x60] sm:$0xff]   ;;  %v596_v8 = vld [vmem:[%s877_s1 + $0x58] sm:$0xff]   ;;  %v598_v10 = vld [vmem:[%s877_s1 + $0x50] sm:$0xff]  }
   0x4   :  { %510 = vmatprep.subr.bf16.mxu0 %v590_v2  ;;  %573 = vmatprep.subr.bf16.mxu1 %v590_v2  ;;  %v595_v7 = vld [vmem:[%s877_s1 + $0x20] sm:$0xff]   ;;  %v597_v9 = vld [vmem:[%s877_s1 + $0x18] sm:$0xff]   ;;  %v599_v13 = vld [vmem:[%s877_s1 + $0x10] sm:$0xff]  }
   0x5   :  { %v606_v11 = vld [vmem:[%s878_s0 + $0x4] ss:$8 sps:$4 sm:$0xff]   ;;  %v604_v18 = vld [vmem:[%s878_s0] ss:$8 sps:$4 sm:$0xff]   ;;  %v610_v20 = vld [vmem:[%s878_s0 + $0x14] ss:$8 sps:$4 sm:$0xff]  }
   0x6   :  { %v609_v12 = vld [vmem:[%s878_s0 + $0x44] ss:$8 sps:$4 sm:$0xff]   ;;  %278 = vmatprep.mubr.bf16.mxu0 %v606_v11  ;;  %v607_v19 = vld [vmem:[%s878_s0 + $0x40] ss:$8 sps:$4 sm:$0xff]   ;;  %v612_v21 = vld [vmem:[%s878_s0 + $0x54] ss:$8 sps:$4 sm:$0xff]  }
   0x7   :  { %511 = vmatpush3.bf16.msra.mxu0 %v591_v3  ;;  %581 = vmatpush3.bf16.msra.mxu1 %v591_v3  ;;  %v600_v14 = vld [vmem:[%s877_s1 + $0x48] sm:$0xff]   ;;  %v602_v16 = vld [vmem:[%s877_s1 + $0x40] sm:$0xff]   ;;  %v614_v22 = vld [vmem:[%s878_s0 + $0x10] ss:$8 sps:$4 sm:$0xff]  }
   0x8   :  { %512 = vmatprep.subr.bf16.mxu0 %v592_v4  ;;  %574 = vmatprep.subr.bf16.mxu1 %v592_v4  ;;  %v601_v15 = vld [vmem:[%s877_s1 + $0x8] sm:$0xff]   ;;  %v603_v17 = vld [vmem:[%s877_s1] sm:$0xff]   ;;  %v615_v23 = vld [vmem:[%s878_s0 + $0x50] ss:$8 sps:$4 sm:$0xff]  }
   0x9   :  { %310 = vmatprep.mubr.bf16.mxu1 %v609_v12  ;;  %v616_v24 = vld [vmem:[%s878_s0 + $0x24] ss:$8 sps:$4 sm:$0xff]   ;;  %v620_v26 = vld [vmem:[%s878_s0 + $0x20] ss:$8 sps:$4 sm:$0xff]   ;;  %v622_v28 = vld [vmem:[%s878_s0 + $0x34] ss:$8 sps:$4 sm:$0xff]  }
   0xa   :  { %v618_v25 = vld [vmem:[%s878_s0 + $0x64] ss:$8 sps:$4 sm:$0xff]   ;;  %v621_v27 = vld [vmem:[%s878_s0 + $0x60] ss:$8 sps:$4 sm:$0xff]   ;;  %v624_v29 = vld [vmem:[%s878_s0 + $0x74] ss:$8 sps:$4 sm:$0xff]  }
   0xb   :  { %513 = vmatpush3.bf16.msra.mxu0 %v593_v5  ;;  %582 = vmatpush3.bf16.msra.mxu1 %v593_v5  ;;  %v626_v30 = vld [vmem:[%s878_s0 + $0x30] ss:$8 sps:$4 sm:$0xff]   ;;  %v811_v34 = vld [vmem:[%s879_s2] ss:$0 sm:$0xff] }
   0xc   :  { %514 = vmatprep.subr.bf16.mxu0 %v594_v6  ;;  %575 = vmatprep.subr.bf16.mxu1 %v594_v6  ;;  %v627_v31 = vld [vmem:[%s878_s0 + $0x70] ss:$8 sps:$4 sm:$0xff]  }
   0xf   :  { %515 = vmatpush3.bf16.msra.mxu0 %v595_v7  ;;  %583 = vmatpush3.bf16.msra.mxu1 %v595_v7 }
  0x10   :  { %516 = vmatprep.subr.bf16.mxu0 %v596_v8  ;;  %576 = vmatprep.subr.bf16.mxu1 %v596_v8 }
  0x13   :  { %517 = vmatpush3.bf16.msra.mxu0 %v597_v9  ;;  %584 = vmatpush3.bf16.msra.mxu1 %v597_v9 }
  0x14   :  { %518 = vmatprep.subr.bf16.mxu0 %v598_v10  ;;  %577 = vmatprep.subr.bf16.mxu1 %v598_v10 }
  0x17   :  { %519 = vmatpush3.bf16.msra.mxu0 %v599_v13  ;;  %585 = vmatpush3.bf16.msra.mxu1 %v599_v13 }
  0x18   :  { %520 = vmatprep.subr.bf16.mxu0 %v600_v14  ;;  %578 = vmatprep.subr.bf16.mxu1 %v600_v14 }
  0x1b   :  { %521 = vmatpush3.bf16.msra.mxu0 %v601_v15  ;;  %586 = vmatpush3.bf16.msra.mxu1 %v601_v15 }
  0x1c   :  { %522 = vmatprep.subr.bf16.mxu0 %v602_v16  ;;  %579 = vmatprep.subr.bf16.mxu1 %v602_v16 }
  0x1f   :  { %523 = vmatpush3.bf16.msra.mxu0 %v603_v17  ;;  %587 = vmatpush3.bf16.msra.mxu1 %v603_v17 }
  0x22   :  { %279 = vmatmul.mubr.bf16.vlgmr.msra.gmra.mxu0 %v604_v18  ;;  %311 = vmatmul.mubr.bf16.vlgmr.msra.gmra.mxu1 %v607_v19 }
  0x23   :  { %286 = vmatprep.mubr.bf16.mxu0 %v610_v20  ;;  %318 = vmatprep.mubr.bf16.mxu1 %v612_v21 }
  0x2a   :  { %287 = vmatmul.mubr.bf16.gmra.mxu0 %v614_v22  ;;  %319 = vmatmul.mubr.bf16.gmra.mxu1 %v615_v23 }
  0x2b   :  { %294 = vmatprep.mubr.bf16.mxu0 %v616_v24  ;;  %326 = vmatprep.mubr.bf16.mxu1 %v618_v25 }
  0x32   :  { %295 = vmatmul.mubr.bf16.gmra.mxu0 %v620_v26  ;;  %327 = vmatmul.mubr.bf16.gmra.mxu1 %v621_v27 }
  0x33   :  { %302 = vmatprep.mubr.bf16.mxu0 %v622_v28  ;;  %334 = vmatprep.mubr.bf16.mxu1 %v624_v29 }
  0x3a   :  { %303 = vmatmul.mubr.bf16.gmra.mxu0 %v626_v30  ;;  %335 = vmatmul.mubr.bf16.gmra.mxu1 %v627_v31 }
  0xe2   :  { %v524_v32 = vpop.f32.mrf.mxu0  ;;  %v548_v33 = vpop.f32.mrf.mxu1 }
  0xe4   :  { %v525_v35 = vpop.f32.mrf.mxu0  ;;  %v549_v36 = vpop.f32.mrf.mxu1 }
  0xe5   :  { %v526_v37 = vadd.f32 %v525_v35, %v524_v32  ;;  %v550_v38 = vadd.f32 %v549_v36, %v548_v33 }
  0xe6   :  { %v527_v39 = vpop.f32.mrf.mxu0  ;;  %v551_v40 = vpop.f32.mrf.mxu1 }
  0xe7   :  { %v281_v41 = vadd.f32 %v526_v37, %v811_v34  ;;  %v313_v42 = vadd.f32 %v550_v38, %v811_v34 }
  0xe8   :  { %v528_v43 = vpop.f32.mrf.mxu0  ;;  %v552_v44 = vpop.f32.mrf.mxu1 }
  0xe9   :  { %v492_v45 = vmul.f32 -1.442695, %v281_v41  ;;  %v500_v46 = vmul.f32 -1.442695, %v313_v42  ;;  %v529_v47 = vadd.f32 %v528_v43, %v527_v39  ;;  %v553_v48 = vadd.f32 %v552_v44, %v551_v40 }
  0xea   :  { %v530_v49 = vpop.f32.mrf.mxu0  ;;  %v554_v50 = vpop.f32.mrf.mxu1 }
  0xeb   :  { %628 = vpow2.f32 %v492_v45  ;;  %v284_v51 = vadd.f32 %v529_v47, %v811_v34  ;;  %v316_v52 = vadd.f32 %v553_v48, %v811_v34 }
  0xec   :  { %630 = vpow2.f32 %v500_v46  ;;  %v531_v53 = vpop.f32.mrf.mxu0  ;;  %v555_v54 = vpop.f32.mrf.mxu1 }
  0xed   :  { %v493_v55 = vmul.f32 -1.442695, %v284_v51  ;;  %v501_v56 = vmul.f32 -1.442695, %v316_v52  ;;  %v532_v57 = vadd.f32 %v531_v53, %v530_v49  ;;  %v556_v58 = vadd.f32 %v555_v54, %v554_v50 }
  0xee   :  { %v533_v59 = vpop.f32.mrf.mxu0  ;;  %v557_v60 = vpop.f32.mrf.mxu1 }
  0xef   :  { %632 = vpow2.f32 %v493_v55  ;;  %v289_v61 = vadd.f32 %v532_v57, %v811_v34  ;;  %v321_v62 = vadd.f32 %v556_v58, %v811_v34 }
  0xf0   :  { %634 = vpow2.f32 %v501_v56  ;;  %v534_v63 = vpop.f32.mrf.mxu0  ;;  %v558_v0 = vpop.f32.mrf.mxu1 }
  0xf1   :  { %v494_v1 = vmul.f32 -1.442695, %v289_v61  ;;  %v502_v2 = vmul.f32 -1.442695, %v321_v62  ;;  %v535_v3 = vadd.f32 %v534_v63, %v533_v59  ;;  %v559_v4 = vadd.f32 %v558_v0, %v557_v60 }
  0xf2   :  { %v536_v5 = vpop.f32.mrf.mxu0  ;;  %v560_v6 = vpop.f32.mrf.mxu1 }
  0xf3   :  { %636 = vpow2.f32 %v494_v1  ;;  %v292_v7 = vadd.f32 %v535_v3, %v811_v34  ;;  %v324_v8 = vadd.f32 %v559_v4, %v811_v34 }
  0xf4   :  { %638 = vpow2.f32 %v502_v2  ;;  %v537_v9 = vpop.f32.mrf.mxu0  ;;  %v561_v10 = vpop.f32.mrf.mxu1 }
  0xf5   :  { %v495_v11 = vmul.f32 -1.442695, %v292_v7  ;;  %v503_v12 = vmul.f32 -1.442695, %v324_v8  ;;  %v538_v13 = vadd.f32 %v537_v9, %v536_v5  ;;  %v562_v14 = vadd.f32 %v561_v10, %v560_v6 }
  0xf6   :  { %v539_v15 = vpop.f32.mrf.mxu0  ;;  %v563_v16 = vpop.f32.mrf.mxu1 }
  0xf7   :  { %640 = vpow2.f32 %v495_v11  ;;  %v297_v17 = vadd.f32 %v538_v13, %v811_v34  ;;  %v329_v18 = vadd.f32 %v562_v14, %v811_v34 }
  0xf8   :  { %v629_v19 = vpop.eup %628  ;;  %642 = vpow2.f32 %v503_v12  ;;  %v540_v20 = vpop.f32.mrf.mxu0 }
  0xf9   :  { %v564_v21 = vpop.f32.mrf.mxu1  ;;  %v631_v22 = vpop.eup %630  ;;  %v391_v23 = vadd.f32 1.0, %v629_v19  ;;  %v496_v24 = vmul.f32 -1.442695, %v297_v17  ;;  %v541_v25 = vadd.f32 %v540_v20, %v539_v15  ;;  %v504_v27 = vmul.f32 -1.442695, %v329_v18 }
  0xfa   :  { %v399_v26 = vadd.f32 1.0, %v631_v22  ;;  %v565_v28 = vadd.f32 %v564_v21, %v563_v16  ;;  %v542_v29 = vpop.f32.mrf.mxu0 }
  0xfb   :  { %v566_v30 = vpop.f32.mrf.mxu1  ;;  %644 = vrcp.f32 %v391_v23  ;;  %v300_v31 = vadd.f32 %v541_v25, %v811_v34 }
  0xfc   :  { %v633_v32 = vpop.eup %632  ;;  %646 = vrcp.f32 %v399_v26  ;;  %v332_v33 = vadd.f32 %v565_v28, %v811_v34  ;;  %v543_v35 = vpop.f32.mrf.mxu0 }
  0xfd   :  { %v567_v36 = vpop.f32.mrf.mxu1  ;;  %v635_v37 = vpop.eup %634  ;;  %v392_v38 = vadd.f32 1.0, %v633_v32  ;;  %648 = vpow2.f32 %v496_v24  ;;  %v497_v39 = vmul.f32 -1.442695, %v300_v31  ;;  %v544_v40 = vadd.f32 %v543_v35, %v542_v29 }
  0xfe   :  { %v400_v41 = vadd.f32 1.0, %v635_v37  ;;  %650 = vpow2.f32 %v504_v27  ;;  %v505_v42 = vmul.f32 -1.442695, %v332_v33  ;;  %v568_v43 = vadd.f32 %v567_v36, %v566_v30  ;;  %v545_v44 = vpop.f32.mrf.mxu0 }
  0xff   :  { %v569_v45 = vpop.f32.mrf.mxu1  ;;  %652 = vrcp.f32 %v392_v38  ;;  %v305_v46 = vadd.f32 %v544_v40, %v811_v34 }
 0x100   :  { %v637_v47 = vpop.eup %636  ;;  %654 = vrcp.f32 %v400_v41  ;;  %v337_v48 = vadd.f32 %v568_v43, %v811_v34  ;;  %v546_v49 = vpop.f32.mrf.mxu0 }
 0x101   :  { %v570_v50 = vpop.f32.mrf.mxu1  ;;  %v639_v51 = vpop.eup %638  ;;  %v393_v52 = vadd.f32 1.0, %v637_v47  ;;  %656 = vpow2.f32 %v497_v39  ;;  %v498_v53 = vmul.f32 -1.442695, %v305_v46  ;;  %v547_v54 = vadd.f32 %v546_v49, %v545_v44 }
 0x102   :  { %v401_v55 = vadd.f32 1.0, %v639_v51  ;;  %658 = vpow2.f32 %v505_v42  ;;  %v506_v56 = vmul.f32 -1.442695, %v337_v48  ;;  %v571_v57 = vadd.f32 %v570_v50, %v569_v45 }
 0x103   :  { %660 = vrcp.f32 %v393_v52  ;;  %v308_v58 = vadd.f32 %v547_v54, %v811_v34 }
 0x104   :  { %v641_v59 = vpop.eup %640  ;;  %662 = vrcp.f32 %v401_v55  ;;  %v340_v60 = vadd.f32 %v571_v57, %v811_v34 }
 0x105   :  { %v643_v61 = vpop.eup %642  ;;  %v394_v62 = vadd.f32 1.0, %v641_v59  ;;  %664 = vpow2.f32 %v498_v53  ;;  %v499_v63 = vmul.f32 -1.442695, %v308_v58 }
 0x106   :  { %v402_v0 = vadd.f32 1.0, %v643_v61  ;;  %666 = vpow2.f32 %v506_v56  ;;  %v507_v1 = vmul.f32 -1.442695, %v340_v60 }
 0x107   :  { %668 = vrcp.f32 %v394_v62 }
 0x108   :  { %v645_v2 = vpop.eup %644  ;;  %670 = vrcp.f32 %v402_v0 }
 0x109   :  { %v647_v3 = vpop.eup %646  ;;  %439 = vst [vmem:[%s880_s3] sm:$0xff] %v645_v2  ;;  %672 = vpow2.f32 %v499_v63 }
 0x10a   :  { %v649_v4 = vpop.eup %648  ;;  %447 = vst [vmem:[%s880_s3 + $0x40] sm:$0xff] %v647_v3  ;;  %674 = vpow2.f32 %v507_v1 }
 0x10b   :  { %v651_v34 = vpop.eup %650  ;;  %v395_v5 = vadd.f32 1.0, %v649_v4 }
 0x10c   :  { %v653_v6 = vpop.eup %652  ;;  %v403_v7 = vadd.f32 1.0, %v651_v34 }
 0x10d   :  { %v655_v8 = vpop.eup %654  ;;  %440 = vst [vmem:[%s880_s3 + $0x8] sm:$0xff] %v653_v6  ;;  %676 = vrcp.f32 %v395_v5 }
 0x10e   :  { %v657_v9 = vpop.eup %656  ;;  %448 = vst [vmem:[%s880_s3 + $0x48] sm:$0xff] %v655_v8  ;;  %678 = vrcp.f32 %v403_v7 }
 0x10f   :  { %v659_v10 = vpop.eup %658  ;;  %v396_v11 = vadd.f32 1.0, %v657_v9 }
 0x110   :  { %v661_v12 = vpop.eup %660  ;;  %v404_v13 = vadd.f32 1.0, %v659_v10 }
 0x111   :  { %v663_v14 = vpop.eup %662  ;;  %441 = vst [vmem:[%s880_s3 + $0x10] sm:$0xff] %v661_v12  ;;  %680 = vrcp.f32 %v396_v11 }
 0x112   :  { %v665_v15 = vpop.eup %664  ;;  %449 = vst [vmem:[%s880_s3 + $0x50] sm:$0xff] %v663_v14  ;;  %682 = vrcp.f32 %v404_v13 }
 0x113   :  { %v667_v16 = vpop.eup %666  ;;  %v397_v17 = vadd.f32 1.0, %v665_v15 }
 0x114   :  { %v669_v18 = vpop.eup %668  ;;  %v405_v19 = vadd.f32 1.0, %v667_v16 }
 0x115   :  { %v671_v20 = vpop.eup %670  ;;  %442 = vst [vmem:[%s880_s3 + $0x18] sm:$0xff] %v669_v18  ;;  %684 = vrcp.f32 %v397_v17 }
 0x116   :  { %v673_v21 = vpop.eup %672  ;;  %450 = vst [vmem:[%s880_s3 + $0x58] sm:$0xff] %v671_v20  ;;  %686 = vrcp.f32 %v405_v19 }
 0x117   :  { %v675_v22 = vpop.eup %674  ;;  %v398_v23 = vadd.f32 1.0, %v673_v21 }
 0x118   :  { %v406_v24 = vadd.f32 1.0, %v675_v22 }
 0x119   :  { %688 = vrcp.f32 %v398_v23 }
 0x11a   :  { %v677_v25 = vpop.eup %676  ;;  %690 = vrcp.f32 %v406_v24 }
 0x11b   :  { %v679_v26 = vpop.eup %678  ;;  %443 = vst [vmem:[%s880_s3 + $0x20] sm:$0xff] %v677_v25 }
 0x11c   :  { %451 = vst [vmem:[%s880_s3 + $0x60] sm:$0xff] %v679_v26 }
 0x11e   :  { %v681_v27 = vpop.eup %680 }
 0x11f   :  { %v683_v28 = vpop.eup %682  ;;  %444 = vst [vmem:[%s880_s3 + $0x28] sm:$0xff] %v681_v27 }
 0x120   :  { %452 = vst [vmem:[%s880_s3 + $0x68] sm:$0xff] %v683_v28 }
 0x122   :  { %v685_v29 = vpop.eup %684 }
 0x123   :  { %v687_v30 = vpop.eup %686  ;;  %445 = vst [vmem:[%s880_s3 + $0x30] sm:$0xff] %v685_v29 }
 0x124   :  { %453 = vst [vmem:[%s880_s3 + $0x70] sm:$0xff] %v687_v30 }
 0x126   :  { %v689_v31 = vpop.eup %688 }
 0x127   :  { %v691_v32 = vpop.eup %690  ;;  %446 = vst [vmem:[%s880_s3 + $0x38] sm:$0xff] %v689_v31 }
 0x128   :  { %454 = vst [vmem:[%s880_s3 + $0x78] sm:$0xff] %v691_v32 }

// kernel: rsfnet_forward.8
= control target key start
LH: loop header
LB: loop body
LE: loop exit
PB: predicated region body
PF: predicated region fallthrough
CT: control target
= control target key end

     0   :  { %v180_v0 = vmov 0.0   ;;  %vm181_vm0 = vmmov 0   ;;  %s235_s1 = inlined_call_operand.vmem [shape: bf16[128,128], index: 1, kind: input, shape index: {}]   ;;  %s236_s0 = inlined_call_operand.vmem [shape: bf16[8,128], index: 0, kind: input, shape index: {}]   ;;  %s237_s2 = inlined_call_operand.vmem [shape: f32[1,128], index: 2, kind: input, shape index: {}]   ;;  %s238_s3 = inlined_call_operand.vmem [shape: f32[8,128], index: 3, kind: output, shape index: {}]  }
   0x1   :  { %150 = vmatprep.subr.bf16.mxu0 %v180_v0  ;;  %v172_v1 = vld [vmem:[%s235_s1 + $0x38] sm:$0xff]   ;;  %166 = vmatprep.mubr.msk.bf16.mxu0 %vm181_vm0, %v180_v0  ;;  %v173_v2 = vld [vmem:[%s235_s1 + $0x30] sm:$0xff]   ;;  %v174_v3 = vld [vmem:[%s235_s1 + $0x28] sm:$0xff]  }
   0x2   :  { %151 = vmatpush3.bf16.msra.mxu0 %v172_v1  ;;  %v175_v4 = vld [vmem:[%s235_s1 + $0x20] sm:$0xff]   ;;  %v176_v5 = vld [vmem:[%s235_s1 + $0x18] sm:$0xff]   ;;  %v177_v6 = vld [vmem:[%s235_s1 + $0x10] sm:$0xff]  }
   0x3   :  { %152 = vmatprep.subr.bf16.mxu0 %v180_v0  ;;  %v178_v7 = vld [vmem:[%s235_s1 + $0x8] sm:$0xff]   ;;  %v179_v8 = vld [vmem:[%s235_s1] sm:$0xff]  }
   0x4   :  { %v15_v9 = vld [vmem:[%s236_s0] sm:$0xf] }
   0x5   :  { %v132_v10 = vld [vmem:[%s237_s2] ss:$0 sm:$0xff] }
   0x6   :  { %153 = vmatpush3.bf16.msra.mxu0 %v173_v2 }
   0x7   :  { %154 = vmatprep.subr.bf16.mxu0 %v180_v0 }
   0xa   :  { %155 = vmatpush3.bf16.msra.mxu0 %v174_v3 }
   0xb   :  { %156 = vmatprep.subr.bf16.mxu0 %v180_v0 }
   0xe   :  { %157 = vmatpush3.bf16.msra.mxu0 %v175_v4 }
   0xf   :  { %158 = vmatprep.subr.bf16.mxu0 %v180_v0 }
  0x12   :  { %159 = vmatpush3.bf16.msra.mxu0 %v176_v5 }
  0x13   :  { %160 = vmatprep.subr.bf16.mxu0 %v180_v0 }
  0x16   :  { %161 = vmatpush3.bf16.msra.mxu0 %v177_v6 }
  0x17   :  { %162 = vmatprep.subr.bf16.mxu0 %v180_v0 }
  0x1a   :  { %163 = vmatpush3.bf16.msra.mxu0 %v178_v7 }
  0x1b   :  { %164 = vmatprep.subr.bf16.mxu0 %v180_v0 }
  0x1e   :  { %165 = vmatpush3.bf16.msra.mxu0 %v179_v8 }
  0x21   :  { %167 = vmatmul.mubr.bf16.vlgmr.msra.gmra.mxu0 %v15_v9 }
  0xe1   :  { %v121_v11 = vpop.f32.mrf.mxu0 }
  0xe2   :  { %v122_v12 = vadd.f32 %v132_v10, %v121_v11 }
  0xe3   :  { %v168_v13 = vpop.f32.mrf.mxu0 }
  0xe4   :  { %127 = vst [vmem:[%s238_s3] sm:$0xff] %v122_v12 }
  0xe5   :  { %v124_v14 = vpop.f32.mrf.mxu0 }
  0xe7   :  { %v169_v15 = vpop.f32.mrf.mxu0 }

// kernel: rsfnet_forward.9
= control target key start
LH: loop header
LB: loop body
LE: loop exit
PB: predicated region body
PF: predicated region fallthrough
CT: control target
= control target key end

     0   :  { %s1005_s15 = smov 0   ;;  %s1007_s16 = smov 0   ;;  %s1201_s0 = inlined_call_operand.vmem [shape: f32[2,3,256], index: 0, kind: input, shape index: {}]   ;;  %s1202_s1 = inlined_call_operand.vmem [shape: f32[2,8,256], index: 1, kind: input, shape index: {}]   ;;  %s1203_s2 = inlined_call_operand.vmem [shape: f32[2,8,3], index: 2, kind: input, shape index: {}]   ;;  %s1204_s3 = inlined_call_operand.vmem [shape: f32[2,3,256], index: 3, kind: output, shape index: {0}]   ;;  %s1205_s4 = inlined_call_operand.vmem [shape: bf16[2,8,3,256], index: 4, kind: output, shape index: {1}]  }
   0x1   :  { %s1009_s17 = smov 0  }
   0x2 LB: > { %s27_s18 = sadd.s32 1, %s973_s16  ;;  %p890_p0 = scmp.ge.s32.totalorder %s977_s17, 1  ;;  %s977_s17 = sphi %s1009_s17, %s15_s17   ;;  %s973_s16 = sphi %s1007_s16, %s1211_s16   ;;  %s969_s15 = sphi %s1005_s15, %s1210_s15  }
   0x3   : > { %p29_p1 = scmp.ge.s32.totalorder %s27_s18, 2  ;;  %p214_p2 = scmp.lt.s32.totalorder %s977_s17, 3 }
   0x5   : > { %s1213_s18 = smov (%p29_p1, %s27_s18), 0  ;;  %p215_p3 = pnand %p890_p0, %p214_p2 }
   0x6   : > { %p271_p4 = scmp.lt.s32.totalorder (!%p215_p3), %s969_s15, 1 }
   0x7   : > { %218 = sbr.rel (%p215_p3) target bundleno = 189 (0xbd), region = 32 }
   0xc   : > { %v319_v0 = vlaneseq  ;;  %s1215_s15 = smov (!%p271_p4, %s969_s15), 1  ;;  %v979_v38 = vmov 1983009808   ;;  %vm361_vm0 = vcmask 1041408   ;;  %vm362_vm1 = vsmask.f32 1280 }
   0xd   : > { %s1028_s19 = sshll.u32 %s1215_s15, 3  ;;  %s925_s20 = sshll.u32 %s1215_s15, 4  ;;  %v354_v39 = vunpack.c.l.s4 %v979_v38  ;;  %vm364_vm2 = vcmask 1043458   ;;  %vm365_vm3 = vsmask.f32 3328  ;;  %vm1107_vm4 = vmand %vm361_vm0, %vm362_vm1 }
   0xe   : > { %v1025_v1 = vshrl.u32 %v319_v0, 7  ;;  %s293_s23 = scalar_lea.vmem %s1203_s2, %s1028_s19  ;;  %s288_s26 = scalar_lea.vmem %s1202_s1, %s925_s20  ;;  %vm366_vm5 = vmand %vm364_vm2, %vm365_vm3 }
   0xf   : > { %v317_v3 = vld [vmem:[%s293_s23] sm:$0xff]  ;;  %v1042_v6 = vld [vmem:[%s288_s26 + $0x8] sm:$0xff]  ;;  %s278_s29 = scalar_lea.vmem %s1201_s0, %s1028_s19  ;;  %v355_v46 = vunpack.c.0.s8 %v354_v39  ;;  %s927_s30 = sshll.u32 %s1215_s15, 5  ;;  %vm1130_vm6 = vmor %vm366_vm5, %vm1107_vm4 }
  0x10   : > { %v423_v2 = vsub.s32 2, %v1025_v1  ;;  %v321_v4 = vsub.s32 0, %v1025_v1  ;;  %v1040_v5 = vld [vmem:[%s288_s26] sm:$0xff]  ;;  %953 = vtanh.f32 %v317_v3  ;;  %v471_v11 = vsub.s32 3, %v1025_v1  ;;  %s1115_s7 = scalar_lea.vmem %s1205_s4, %s927_s30  ;;  %s302_s10 = scalar_lea.vmem %s1204_s3, %s1028_s19 }
  0x11   : > { %v375_v12 = vsub.s32 1, %v1025_v1  ;;  %v1055_v17 = vsub.s32 5, %v1025_v1  ;;  %v1058_v18 = vsub.s32 4, %v1025_v1  ;;  %v1069_v28 = vsub.s32 7, %v1025_v1  ;;  %v1090_v51 = vld [vmem:[%s278_s29] sm:$0x77] }
  0x12   : > { %v431_v7 = vrot.slane %v1040_v5, %v423_v2  ;;  %v435_v8 = vrot.slane %v1042_v6, %v423_v2  ;;  %v329_v9 = vrot.slane %v1040_v5, %v321_v4  ;;  %v333_v10 = vrot.slane %v1042_v6, %v321_v4 }
  0x13   : > { %v479_v13 = vrot.slane %v1040_v5, %v471_v11  ;;  %v483_v14 = vrot.slane %v1042_v6, %v471_v11  ;;  %v383_v15 = vrot.slane %v1040_v5, %v375_v12  ;;  %v387_v16 = vrot.slane %v1042_v6, %v375_v12 }
  0x14   : > { %v575_v19 = vrot.slane %v1040_v5, %v1055_v17  ;;  %v579_v20 = vrot.slane %v1042_v6, %v1055_v17  ;;  %v527_v21 = vrot.slane %v1040_v5, %v1058_v18  ;;  %v531_v22 = vrot.slane %v1042_v6, %v1058_v18 }
  0x15   : > { %v1072_v29 = vsub.s32 6, %v1025_v1  ;;  %v671_v30 = vrot.slane %v1040_v5, %v1069_v28  ;;  %v675_v31 = vrot.slane %v1042_v6, %v1069_v28  ;;  %v1093_v58 = vsub.s32 %v355_v46, %v1025_v1 }
  0x17   : > { %v623_v32 = vrot.slane %v1040_v5, %v1072_v29  ;;  %v627_v33 = vrot.slane %v1042_v6, %v1072_v29 }
  0x1d   : > { %v954_v23 = vpop.eup %953 }
  0x1e   : > { %v424_v24 = vrot.slane %v954_v23, %v423_v2  ;;  %v322_v25 = vrot.slane %v954_v23, %v321_v4  ;;  %v472_v26 = vrot.slane %v954_v23, %v471_v11  ;;  %v376_v27 = vrot.slane %v954_v23, %v375_v12 }
  0x1f   : > { %v568_v34 = vrot.slane %v954_v23, %v1055_v17  ;;  %v520_v35 = vrot.slane %v954_v23, %v1058_v18  ;;  %v664_v36 = vrot.slane %v954_v23, %v1069_v28  ;;  %v616_v37 = vrot.slane %v954_v23, %v1072_v29 }
  0x20   : > { %426 = vbcast.lane.b32.xlu1 %v424_v24, 256  ;;  %324 = vbcast.lane.b32.xlu0 %v322_v25, 256 }
  0x24   : > { %474 = vbcast.lane.b32.xlu1 %v472_v26, 256  ;;  %378 = vbcast.lane.b32.xlu0 %v376_v27, 256 }
  0x28   : > { %570 = vbcast.lane.b32.xlu1 %v568_v34, 256  ;;  %522 = vbcast.lane.b32.xlu0 %v520_v35, 256 }
  0x2c   : > { %666 = vbcast.lane.b32.xlu1 %v664_v36, 256  ;;  %618 = vbcast.lane.b32.xlu0 %v616_v37, 256 }
  0x92   : > { %v427_v40 = vpop.permute.xlu1 %426  ;;  %v325_v41 = vpop.permute.xlu0 %324 }
  0x93   : > { %v436_v42 = vmul.f32 %v431_v7, %v427_v40  ;;  %v437_v43 = vmul.f32 %v435_v8, %v427_v40  ;;  %v334_v44 = vmul.f32 %v329_v9, %v325_v41  ;;  %v335_v45 = vmul.f32 %v333_v10, %v325_v41 }
  0x95   : > { %v438_v47 = vadd.f32 1.0, %v436_v42  ;;  %v439_v48 = vadd.f32 1.0, %v437_v43  ;;  %v336_v49 = vadd.f32 1.0, %v334_v44  ;;  %v337_v50 = vadd.f32 1.0, %v335_v45 }
  0x96   : > { %v475_v52 = vpop.permute.xlu1 %474  ;;  %v379_v53 = vpop.permute.xlu0 %378 }
  0x97   : > { %v442_v54 = vcombine.low %v438_v47, %v439_v48  ;;  %v340_v55 = vcombine.low %v336_v49, %v337_v50  ;;  %v484_v56 = vmul.f32 %v479_v13, %v475_v52  ;;  %v485_v57 = vmul.f32 %v483_v14, %v475_v52  ;;  %v368_v49 = vld [vmem:[%s1115_s7] sm:$0xf] }
  0x98   : > { %v388_v59 = vmul.f32 %v383_v15, %v379_v53  ;;  %v389_v60 = vmul.f32 %v387_v16, %v379_v53 }
  0x99   : > { %v444_v61 = vmul.f32 %v442_v54, %v1090_v51  ;;  %v342_v62 = vmul.f32 %v340_v55, %v1090_v51  ;;  %v486_v63 = vadd.f32 1.0, %v484_v56  ;;  %v487_v0 = vadd.f32 1.0, %v485_v57 }
  0x9a   : > { %v390_v2 = vadd.f32 1.0, %v388_v59  ;;  %v391_v3 = vadd.f32 1.0, %v389_v60  ;;  %v419_v4 = vadd.f32 %v388_v59, %v334_v44  ;;  %v420_v7 = vadd.f32 %v389_v60, %v335_v45  ;;  %v571_v8 = vpop.permute.xlu1 %570  ;;  %v523_v16 = vpop.permute.xlu0 %522 }
  0x9b   : > { %v445_v9 = vmax.f32 %v444_v61, 0.0  ;;  %v343_v10 = vmax.f32 %v342_v62, 0.0  ;;  %v490_v11 = vcombine.low %v486_v63, %v487_v0  ;;  %v580_v1 = vmul.f32 %v575_v19, %v571_v8 }
  0x9c   : > { %v394_v12 = vcombine.low %v390_v2, %v391_v3  ;;  %v467_v13 = vadd.f32 %v436_v42, %v419_v4  ;;  %v468_v14 = vadd.f32 %v437_v43, %v420_v7  ;;  %v581_v15 = vmul.f32 %v579_v20, %v571_v8  ;;  %v908_v3 = vld [vmem:[%s1115_s7 + $0xc] sm:$0xf] }
  0x9d   : > { %v446_v23 = vmin.f32 %v445_v9, 1.0  ;;  %v344_v24 = vmin.f32 %v343_v10, 1.0  ;;  %v492_v25 = vmul.f32 %v490_v11, %v1090_v51  ;;  %v582_v26 = vadd.f32 1.0, %v580_v1 }
  0x9e   : > { %v396_v19 = vmul.f32 %v394_v12, %v1090_v51  ;;  %v583_v34 = vadd.f32 1.0, %v581_v15  ;;  %v515_v35 = vadd.f32 %v484_v56, %v467_v13  ;;  %v516_v36 = vadd.f32 %v485_v57, %v468_v14  ;;  %v667_v37 = vpop.permute.xlu1 %666  ;;  %v619_v61 = vpop.permute.xlu0 %618 }
  0x9f   : > { %v448_v17 = vcombine.high %v446_v23, %v446_v23  ;;  %v346_v20 = vcombine.high %v344_v24, %v344_v24  ;;  %v493_v38 = vmax.f32 %v492_v25, 0.0  ;;  %v532_v39 = vmul.f32 %v527_v21, %v523_v16  ;;  %v905_v21 = vld [vmem:[%s1115_s7 + $0x8] sm:$0xf] }
  0xa0   : > { %v397_v40 = vmax.f32 %v396_v19, 0.0  ;;  %v586_v41 = vcombine.low %v582_v26, %v583_v34  ;;  %v533_v42 = vmul.f32 %v531_v22, %v523_v16  ;;  %v676_v43 = vmul.f32 %v671_v30, %v667_v37  ;;  %v914_v19 = vld [vmem:[%s1115_s7 + $0x14] sm:$0xf] }
  0xa1   : > { %v904_v44 = vpack.c.bf16 %v448_v17, %v446_v23  ;;  %v900_v45 = vpack.c.bf16 %v346_v20, %v344_v24  ;;  %v494_v46 = vmin.f32 %v493_v38, 1.0  ;;  %v534_v47 = vadd.f32 1.0, %v532_v39 }
  0xa2   : > { %v398_v50 = vmin.f32 %v397_v40, 1.0  ;;  %v588_v18 = vmul.f32 %v586_v41, %v1090_v51  ;;  %v535_v22 = vadd.f32 1.0, %v533_v42  ;;  %v563_v52 = vadd.f32 %v532_v39, %v515_v35  ;;  %v911_v41 = vld [vmem:[%s1115_s7 + $0x10] sm:$0xf] }
  0xa3   : > { %v461_v30 = vrot.slane %v904_v44, %v1093_v58  ;;  %v359_v53 = vrot.slane %v900_v45, %v1093_v58  ;;  %v496_v54 = vcombine.high %v494_v46, %v494_v46  ;;  %v564_v55 = vadd.f32 %v533_v42, %v516_v36 }
  0xa4   : > { %v400_v56 = vcombine.high %v398_v50, %v398_v50  ;;  %v589_v57 = vmax.f32 %v588_v18, 0.0  ;;  %v538_v59 = vcombine.low %v534_v47, %v535_v22  ;;  %v677_v60 = vmul.f32 %v675_v31, %v667_v37  ;;  %v902_v31 = vld [vmem:[%s1115_s7 + $0x4] sm:$0xf] }
  0xa5   : > { %v465_v62 = vsel %vm1130_vm6, %v461_v30, %v905_v21  ;;  %v369_v63 = vsel %vm1130_vm6, %v359_v53, %v368_v49  ;;  %v907_v0 = vpack.c.bf16 %v496_v54, %v494_v46  ;;  %v678_v2 = vadd.f32 1.0, %v676_v43 }
  0xa6   : > { %906 = vst [vmem:[%s1115_s7 + $0x8] sm:$0xf] %v465_v62  ;;  %370 = vst [vmem:[%s1115_s7] sm:$0xf] %v369_v63  ;;  %v901_v4 = vpack.c.bf16 %v400_v56, %v398_v50  ;;  %v590_v7 = vmin.f32 %v589_v57, 1.0  ;;  %v540_v8 = vmul.f32 %v538_v59, %v1090_v51  ;;  %v679_v9 = vadd.f32 1.0, %v677_v60 }
  0xa7   : > { %v509_v28 = vrot.slane %v907_v0, %v1093_v58  ;;  %v611_v10 = vadd.f32 %v580_v1, %v563_v52  ;;  %v612_v11 = vadd.f32 %v581_v15, %v564_v55  ;;  %v628_v12 = vmul.f32 %v623_v32, %v619_v61  ;;  %v920_v50 = vld [vmem:[%s1115_s7 + $0x1c] sm:$0xf]  ;;  %v917_v57 = vld [vmem:[%s1115_s7 + $0x18] sm:$0xf] }
  0xa8   : > { %v413_v13 = vrot.slane %v901_v4, %v1093_v58  ;;  %v592_v14 = vcombine.high %v590_v7, %v590_v7  ;;  %v541_v16 = vmax.f32 %v540_v8, 0.0  ;;  %v682_v23 = vcombine.low %v678_v2, %v679_v9 }
  0xa9   : > { %v513_v24 = vsel %vm1130_vm6, %v509_v28, %v908_v3  ;;  %v629_v25 = vmul.f32 %v627_v33, %v619_v61  ;;  %v630_v1 = vadd.f32 1.0, %v628_v12  ;;  %v659_v26 = vadd.f32 %v628_v12, %v611_v10 }
  0xaa   : > { %909 = vst [vmem:[%s1115_s7 + $0xc] sm:$0xf] %v513_v24  ;;  %v417_v5 = vsel %vm1130_vm6, %v413_v13, %v902_v31  ;;  %v913_v15 = vpack.c.bf16 %v592_v14, %v590_v7  ;;  %v542_v32 = vmin.f32 %v541_v16, 1.0  ;;  %v684_v27 = vmul.f32 %v682_v23, %v1090_v51 }
  0xab   : > { %903 = vst [vmem:[%s1115_s7 + $0x4] sm:$0xf] %v417_v5  ;;  %v631_v34 = vadd.f32 1.0, %v629_v25  ;;  %v660_v35 = vadd.f32 %v629_v25, %v612_v11  ;;  %v707_v36 = vadd.f32 %v676_v43, %v659_v26 }
  0xac   : > { %v605_v6 = vrot.slane %v913_v15, %v1093_v58  ;;  %v544_v29 = vcombine.high %v542_v32, %v542_v32  ;;  %v685_v33 = vmax.f32 %v684_v27, 0.0 }
  0xad   : > { %v634_v37 = vcombine.low %v630_v1, %v631_v34  ;;  %v708_v17 = vadd.f32 %v677_v60, %v660_v35  ;;  %v709_v20 = vadd.f32 1.0, %v707_v36 }
  0xae   : > { %v609_v38 = vsel %vm1130_vm6, %v605_v6, %v914_v19  ;;  %v910_v39 = vpack.c.bf16 %v544_v29, %v542_v32  ;;  %v686_v40 = vmin.f32 %v685_v33, 1.0 }
  0xaf   : > { %915 = vst [vmem:[%s1115_s7 + $0x14] sm:$0xf] %v609_v38  ;;  %v636_v42 = vmul.f32 %v634_v37, %v1090_v51  ;;  %v710_v43 = vadd.f32 1.0, %v708_v17 }
  0xb0   : > { %v557_v44 = vrot.slane %v910_v39, %v1093_v58  ;;  %v688_v45 = vcombine.high %v686_v40, %v686_v40 }
  0xb1   : > { %v637_v46 = vmax.f32 %v636_v42, 0.0  ;;  %v713_v47 = vcombine.low %v709_v20, %v710_v43 }
  0xb2   : > { %v561_v21 = vsel %vm1130_vm6, %v557_v44, %v911_v41  ;;  %v919_v49 = vpack.c.bf16 %v688_v45, %v686_v40 }
  0xb3   : > { %912 = vst [vmem:[%s1115_s7 + $0x10] sm:$0xf] %v561_v21  ;;  %v638_v18 = vmin.f32 %v637_v46, 1.0  ;;  %v715_v22 = vmul.f32 %v713_v47, %v1090_v51 }
  0xb4   : > { %v701_v52 = vrot.slane %v919_v49, %v1093_v58 }
  0xb5   : > { %v640_v30 = vcombine.high %v638_v18, %v638_v18  ;;  %v716_v53 = vmax.f32 %v715_v22, 0.0 }
  0xb6   : > { %v705_v54 = vsel %vm1130_vm6, %v701_v52, %v920_v50 }
  0xb7   : > { %921 = vst [vmem:[%s1115_s7 + $0x1c] sm:$0xf] %v705_v54  ;;  %v916_v55 = vpack.c.bf16 %v640_v30, %v638_v18  ;;  %v717_v56 = vmin.f32 %v716_v53, 1.0 }
  0xb9   : > { %v653_v59 = vrot.slane %v916_v55, %v1093_v58  ;;  %718 = vst [vmem:[%s302_s10] sm:$0x77] %v717_v56 }
  0xbb   : > { %v657_v51 = vsel %vm1130_vm6, %v653_v59, %v917_v57 }
  0xbc   : > { %918 = vst [vmem:[%s1115_s7 + $0x18] sm:$0xf] %v657_v51 }
  0xbd PF: > { %s15_s17 = sadd.s32 1, %s977_s17   ;;  %s1210_s15 = smov %s973_s16 }
  0xbe   : > { %p12_p5 = scmp.ge.s32.totalorder %s15_s17, 4   ;;  %s1211_s16 = smov %s1213_s18 }
  0xc0   :  { %14 = sbr.rel (!%p12_p5) target bundleno = 2 (0x2), region = 87 }

</bundles_post_ra>
